<compile_context>
chip_gen: v7x
topology: tpu7x:2x2x1
jax: 0.10.0
libtpu: 0.0.40
codegen_flags: <defaults>
</compile_context>

<pallas_src>
import jax
import jax.numpy as jnp
from jax.experimental import pallas as pl
from jax.experimental.pallas import tpu as pltpu


def lstm_predictor_kernel(
    x_ref,                        # (T, B, Din)  time-major input
    wih0_ref, whh0_ref, b0_ref,   # (Din, 4H), (H, 4H), (1, 4H)
    w1f_ref, b1_ref,              # (2H, 4H) fused [W_ih1 ; W_hh1], (1, 4H)
    lw1_ref, lb1_ref,             # (H, H/2),  (1, H/2)
    hw1_ref, hb1_ref,             # (H/2, O*H/4), (1, O*H/4)  (lw2/lb2 folded in)
    hw2_ref, hb2_ref,             # (O*H/4, PAD), (1, PAD)    block-diag, lane-padded
    out_ref,                      # (B, PAD)
):
    T, B, Din = x_ref.shape
    H = whh0_ref.shape[0]
    fourH = 4 * H

    # ---- layer-0 input projection hoisted out of the recurrence -------------
    # One (T*B, Din) x (Din, 4H) MXU matmul; b0 folded in here (one broadcast).
    # Time-major layout -> per-step reads below are contiguous static slices.
    x2d = x_ref[...].reshape(T * B, Din)
    xproj = (jnp.dot(x2d, wih0_ref[...], preferred_element_type=jnp.float32)
             + b0_ref[...])                       # (T*B, 4H)
    xproj = xproj.reshape(T, B, fourH)

    whh0 = whh0_ref[...]
    w1f = w1f_ref[...]
    # Hoisted broadcast of the layer-1 bias (JAX does not CSE broadcast_in_dim).
    b1b = jnp.broadcast_to(b1_ref[...], (B, fourH))

    def apply_gates(g, c):
        # PyTorch gate order: i, f, g, o
        i = jax.nn.sigmoid(g[:, 0 * H:1 * H])
        f = jax.nn.sigmoid(g[:, 1 * H:2 * H])
        gg = jnp.tanh(g[:, 2 * H:3 * H])
        o = jax.nn.sigmoid(g[:, 3 * H:4 * H])
        c_new = f * c + i * gg
        h_new = o * jnp.tanh(c_new)
        return h_new, c_new

    zeros = jnp.zeros((B, H), jnp.float32)
    h0, c0, h1, c1 = zeros, zeros, zeros, zeros

    # T is small and static: full unroll; all slices static; LLO overlaps steps.
    for t in range(T):
        # layer 0: only the recurrent matmul is left on the critical path
        g0 = xproj[t] + jnp.dot(h0, whh0, preferred_element_type=jnp.float32)
        h0, c0 = apply_gates(g0, c0)
        # inter-layer dropout: identity at inference time
        # layer 1: single fused K=2H matmul instead of two dependent dots.
        # (a lane concat of two in-vreg values; cheaper than a VMEM round-trip
        #  through a scratch buffer at these sizes)
        h01 = jnp.concatenate([h0, h1], axis=1)          # (B, 2H)
        g1 = jnp.dot(h01, w1f, preferred_element_type=jnp.float32) + b1b
        h1, c1 = apply_gates(g1, c1)

    # ---- trunk + heads -------------------------------------------------------
    # self.linear first Linear + Sigmoid; its second Linear (and bias) has been
    # folded into hw1/hb1 on the host (dropout is identity in eval mode).
    z1 = jax.nn.sigmoid(
        jnp.dot(h1, lw1_ref[...], preferred_element_type=jnp.float32)
        + lb1_ref[...])                                   # (B, H/2)
    hcat = jax.nn.sigmoid(
        jnp.dot(z1, hw1_ref[...], preferred_element_type=jnp.float32)
        + hb1_ref[...])                                   # (B, O*H/4)
    # Block-diagonal second head layer, lane-padded to 128 -> lane-dense store.
    out_ref[...] = (jnp.dot(hcat, hw2_ref[...], preferred_element_type=jnp.float32)
                    + hb2_ref[...])                       # (B, PAD)


def make_params(key, dim_in, hidden, dim_out, out_pad=128):
    H, H2, H4 = hidden, hidden // 2, hidden // 4
    ks = jax.random.split(key, 9)

    def xavier(k, shape):                # PyTorch weight shape (out, in)
        fan_out, fan_in = shape
        std = (2.0 / (fan_in + fan_out)) ** 0.5
        return std * jax.random.normal(k, shape, jnp.float32)

    def linear(kw, kb, out_f, in_f):     # nn.Linear default init
        bound = 1.0 / (in_f ** 0.5)
        w = jax.random.uniform(kw, (out_f, in_f), jnp.float32, -bound, bound)
        b = jax.random.uniform(kb, (out_f,), jnp.float32, -bound, bound)
        return w, b

    # LSTM weights: xavier_normal_, biases: constant 0 (as in the module init).
    # NOTE: PyTorch LSTM has bias_ih + bias_hh per layer; pass their SUM here
    # if real trained weights are ever loaded (zero here).
    w_ih0 = xavier(ks[0], (4 * H, dim_in))
    w_hh0 = xavier(ks[1], (4 * H, H))
    w_ih1 = xavier(ks[2], (4 * H, H))
    w_hh1 = xavier(ks[3], (4 * H, H))
    lstm_b0 = jnp.zeros((1, 4 * H), jnp.float32)
    lstm_b1 = jnp.zeros((1, 4 * H), jnp.float32)

    lw1, lb1 = linear(ks[4], ks[5], H2, H)
    lw2, lb2 = linear(ks[6], ks[7], H2, H2)

    # Per-target heads.
    head_keys = jax.random.split(ks[8], 4 * dim_out)
    w1_list, b1_list, w2_list, b2_list = [], [], [], []
    for k in range(dim_out):
        w1, b1h = linear(head_keys[4 * k + 0], head_keys[4 * k + 1], H4, H2)
        w2, b2h = linear(head_keys[4 * k + 2], head_keys[4 * k + 3], 1, H4)
        w1_list.append(w1.T)          # (H2, H4)
        b1_list.append(b1h)           # (H4,)
        w2_list.append(w2.T)          # (H4, 1)
        b2_list.append(b2h)           # (1,)

    # Fused first head layer.
    hw1 = jnp.concatenate(w1_list, axis=1)               # (H2, O*H4)
    hb1 = jnp.concatenate(b1_list)[None, :]              # (1, O*H4)
    # Fold the trunk's second Linear (lw2, lb2) into the head layer
    # (valid: the Dropouts between them are identity in eval mode).
    lw2T, lb2r = lw2.T, lb2[None, :]                     # (H2,H2), (1,H2)
    hw1f = lw2T @ hw1                                    # (H2, O*H4)
    hb1f = lb2r @ hw1 + hb1                              # (1, O*H4)

    # Block-diagonal second head layer, lane-padded to `out_pad`.
    hw2 = jnp.zeros((dim_out * H4, out_pad), jnp.float32)
    for k in range(dim_out):
        hw2 = hw2.at[k * H4:(k + 1) * H4, k].set(w2_list[k][:, 0])
    hb2 = jnp.zeros((1, out_pad), jnp.float32)
    hb2 = hb2.at[0, :dim_out].set(jnp.concatenate(b2_list))

    # Fused layer-1 recurrent weight [W_ih1 ; W_hh1] -> single (2H, 4H) RHS.
    w1f = jnp.concatenate([w_ih1.T, w_hh1.T], axis=0)

    return dict(
        # kernel params
        wih0=w_ih0.T, whh0=w_hh0.T, b0=lstm_b0,
        w1f=w1f, b1=lstm_b1,
        lw1=lw1.T, lb1=lb1[None, :],
        hw1f=hw1f, hb1f=hb1f, hw2=hw2, hb2=hb2,
        # un-fused copies kept only for the pure-JAX reference check
        ref_wih1=w_ih1.T, ref_whh1=w_hh1.T,
        ref_lw2=lw2.T, ref_lb2=lb2[None, :],
        ref_head_w1=jnp.stack(w1_list), ref_head_b1=jnp.stack(b1_list),
        ref_head_w2=jnp.stack(w2_list), ref_head_b2=jnp.stack(b2_list),
    )


def lstm_predictor_forward(x, params, dim_out):
    """x: (B, T, D_in) float32. Returns list of dim_out arrays of shape (B,)."""
    B, T, Din = x.shape
    out_pad = params["hw2"].shape[1]

    # Time-major layout so per-step xproj reads are contiguous static slices.
    x_tm = jnp.transpose(x, (1, 0, 2))                   # (T, B, Din)

    args = (x_tm,
            params["wih0"], params["whh0"], params["b0"],
            params["w1f"], params["b1"],
            params["lw1"], params["lb1"],
            params["hw1f"], params["hb1f"],
            params["hw2"], params["hb2"])

    out = pl.pallas_call(
        lstm_predictor_kernel,
        out_shape=jax.ShapeDtypeStruct((B, out_pad), jnp.float32),
        in_specs=[pl.BlockSpec(memory_space=pltpu.MemorySpace.VMEM)] * len(args),
        out_specs=pl.BlockSpec(memory_space=pltpu.MemorySpace.VMEM),
    )(*args)

    # Match the PyTorch return: list of dim_out tensors, each reshape(-1) -> (B,)
    return [out[:, k] for k in range(dim_out)]


def lstm_predictor_reference(x, params):
    """Pure-JAX reference (same math as the PyTorch module, eval mode)."""
    B, T, _ = x.shape
    H = params["whh0"].shape[0]
    O = params["ref_head_w1"].shape[0]

    def cell(xt, h, c, wih, whh, b):
        g = xt @ wih + h @ whh + b
        i = jax.nn.sigmoid(g[:, 0 * H:1 * H])
        f = jax.nn.sigmoid(g[:, 1 * H:2 * H])
        gg = jnp.tanh(g[:, 2 * H:3 * H])
        o = jax.nn.sigmoid(g[:, 3 * H:4 * H])
        c = f * c + i * gg
        return o * jnp.tanh(c), c

    h0 = c0 = h1 = c1 = jnp.zeros((B, H), jnp.float32)
    for t in range(T):
        h0, c0 = cell(x[:, t], h0, c0, params["wih0"], params["whh0"], params["b0"])
        h1, c1 = cell(h0, h1, c1, params["ref_wih1"], params["ref_whh1"], params["b1"])

    z = jax.nn.sigmoid(h1 @ params["lw1"] + params["lb1"])
    z = z @ params["ref_lw2"] + params["ref_lb2"]

    outs = []
    for k in range(O):
        hk = jax.nn.sigmoid(z @ params["ref_head_w1"][k] + params["ref_head_b1"][k])
        yk = hk @ params["ref_head_w2"][k] + params["ref_head_b2"][k]
        outs.append(yk[:, 0])
    return outs


if __name__ == "__main__":
    B, T, DIM_IN, HIDDEN, DIM_OUT = 2, 8, 8, 32, 5
    key = jax.random.PRNGKey(0)
    kx, kp = jax.random.split(key)

    x = jax.random.normal(kx, (B, T, DIM_IN), jnp.float32)
    params = make_params(kp, DIM_IN, HIDDEN, DIM_OUT)

    outs = lstm_predictor_forward(x, params, DIM_OUT)
    outs = [jax.block_until_ready(o) for o in outs]
    refs = lstm_predictor_reference(x, params)

    assert len(outs) == DIM_OUT
    assert all(o.shape == (B,) for o in outs)
    assert all(bool(jnp.all(jnp.isfinite(o))) for o in outs)
    for o, r in zip(outs, refs):
        assert bool(jnp.allclose(o, r, atol=1e-4, rtol=1e-4)), (o, r)
    print("KERNEL_OK")
</pallas_src>

<mosaic_0001>
module attributes {stable_mosaic.version = 11 : i64} {
  func.func @lstm_predictor_kernel(%arg0: memref<8x2x8xf32, #tpu.memory_space<vmem>>, %arg1: memref<8x128xf32, #tpu.memory_space<vmem>>, %arg2: memref<32x128xf32, #tpu.memory_space<vmem>>, %arg3: memref<1x128xf32, #tpu.memory_space<vmem>>, %arg4: memref<64x128xf32, #tpu.memory_space<vmem>>, %arg5: memref<1x128xf32, #tpu.memory_space<vmem>>, %arg6: memref<32x16xf32, #tpu.memory_space<vmem>>, %arg7: memref<1x16xf32, #tpu.memory_space<vmem>>, %arg8: memref<16x40xf32, #tpu.memory_space<vmem>>, %arg9: memref<1x40xf32, #tpu.memory_space<vmem>>, %arg10: memref<40x128xf32, #tpu.memory_space<vmem>>, %arg11: memref<1x128xf32, #tpu.memory_space<vmem>>, %arg12: memref<2x128xf32, #tpu.memory_space<vmem>>) attributes {dimension_semantics = [], scalar_prefetch = 0 : i64, scratch_operands = 0 : i64, tpu.core_type = #tpu.core_type<tc>} {
    %c0 = arith.constant 0 : index
    %c0_0 = arith.constant 0 : index
    %c0_1 = arith.constant 0 : index
    %0 = vector.load %arg0[%c0, %c0_0, %c0_1] : memref<8x2x8xf32, #tpu.memory_space<vmem>>, vector<8x2x8xf32>
    %1 = vector.shape_cast %0 : vector<8x2x8xf32> to vector<16x8xf32>
    %c0_2 = arith.constant 0 : index
    %c0_3 = arith.constant 0 : index
    %2 = vector.load %arg1[%c0_2, %c0_3] : memref<8x128xf32, #tpu.memory_space<vmem>>, vector<8x128xf32>
    %cst = arith.constant dense<0.000000e+00> : vector<16x128xf32>
    %3 = tpu.matmul %1, %2, %cst {dimension_numbers = #tpu.dot_dimension_numbers<[1], [0], [0], [1], [0, 0, 1, 1], [], []>} : vector<16x8xf32>, vector<8x128xf32>, vector<16x128xf32> -> vector<16x128xf32>
    %c0_4 = arith.constant 0 : index
    %c0_5 = arith.constant 0 : index
    %4 = vector.load %arg3[%c0_4, %c0_5] : memref<1x128xf32, #tpu.memory_space<vmem>>, vector<1x128xf32>
    %5 = vector.broadcast %4 : vector<1x128xf32> to vector<16x128xf32>
    %6 = arith.addf %3, %5 : vector<16x128xf32>
    %7 = vector.shape_cast %6 : vector<16x128xf32> to vector<8x2x128xf32>
    %c0_6 = arith.constant 0 : index
    %c0_7 = arith.constant 0 : index
    %8 = vector.load %arg2[%c0_6, %c0_7] : memref<32x128xf32, #tpu.memory_space<vmem>>, vector<32x128xf32>
    %c0_8 = arith.constant 0 : index
    %c0_9 = arith.constant 0 : index
    %9 = vector.load %arg4[%c0_8, %c0_9] : memref<64x128xf32, #tpu.memory_space<vmem>>, vector<64x128xf32>
    %c0_10 = arith.constant 0 : index
    %c0_11 = arith.constant 0 : index
    %10 = vector.load %arg5[%c0_10, %c0_11] : memref<1x128xf32, #tpu.memory_space<vmem>>, vector<1x128xf32>
    %11 = vector.shape_cast %10 : vector<1x128xf32> to vector<1x128xf32>
    %12 = vector.broadcast %11 : vector<1x128xf32> to vector<2x128xf32>
    %cst_12 = arith.constant 0.000000e+00 : f32
    %13 = vector.broadcast %cst_12 : f32 to vector<2x32xf32>
    %14 = vector.extract_strided_slice %7 {offsets = [0, 0, 0], sizes = [1, 2, 128], strides = [1, 1, 1]} : vector<8x2x128xf32> to vector<1x2x128xf32>
    %15 = vector.shape_cast %14 : vector<1x2x128xf32> to vector<2x128xf32>
    %cst_13 = arith.constant dense<0.000000e+00> : vector<2x128xf32>
    %16 = tpu.matmul %13, %8, %cst_13 {dimension_numbers = #tpu.dot_dimension_numbers<[1], [0], [0], [1], [0, 0, 1, 1], [], []>} : vector<2x32xf32>, vector<32x128xf32>, vector<2x128xf32> -> vector<2x128xf32>
    %17 = arith.addf %15, %16 : vector<2x128xf32>
    %18 = vector.extract_strided_slice %17 {offsets = [0, 0], sizes = [2, 32], strides = [1, 1]} : vector<2x128xf32> to vector<2x32xf32>
    %19 = arith.negf %18 : vector<2x32xf32>
    %20 = math.exp %19 : vector<2x32xf32>
    %cst_14 = arith.constant 1.000000e+00 : f32
    %21 = vector.broadcast %cst_14 : f32 to vector<2x32xf32>
    %22 = arith.addf %21, %20 : vector<2x32xf32>
    %23 = arith.divf %21, %22 : vector<2x32xf32>
    %24 = vector.extract_strided_slice %17 {offsets = [0, 32], sizes = [2, 32], strides = [1, 1]} : vector<2x128xf32> to vector<2x32xf32>
    %25 = arith.negf %24 : vector<2x32xf32>
    %26 = math.exp %25 : vector<2x32xf32>
    %cst_15 = arith.constant 1.000000e+00 : f32
    %27 = vector.broadcast %cst_15 : f32 to vector<2x32xf32>
    %28 = arith.addf %27, %26 : vector<2x32xf32>
    %29 = arith.divf %27, %28 : vector<2x32xf32>
    %30 = vector.extract_strided_slice %17 {offsets = [0, 64], sizes = [2, 32], strides = [1, 1]} : vector<2x128xf32> to vector<2x32xf32>
    %31 = math.tanh %30 : vector<2x32xf32>
    %32 = vector.extract_strided_slice %17 {offsets = [0, 96], sizes = [2, 32], strides = [1, 1]} : vector<2x128xf32> to vector<2x32xf32>
    %33 = arith.negf %32 : vector<2x32xf32>
    %34 = math.exp %33 : vector<2x32xf32>
    %cst_16 = arith.constant 1.000000e+00 : f32
    %35 = vector.broadcast %cst_16 : f32 to vector<2x32xf32>
    %36 = arith.addf %35, %34 : vector<2x32xf32>
    %37 = arith.divf %35, %36 : vector<2x32xf32>
    %38 = arith.mulf %29, %13 : vector<2x32xf32>
    %39 = arith.mulf %23, %31 : vector<2x32xf32>
    %40 = arith.addf %38, %39 : vector<2x32xf32>
    %41 = math.tanh %40 : vector<2x32xf32>
    %42 = arith.mulf %37, %41 : vector<2x32xf32>
    %43 = tpu.concatenate %42, %13 in 1 : vector<2x32xf32>, vector<2x32xf32> -> vector<2x64xf32>
    %cst_17 = arith.constant dense<0.000000e+00> : vector<2x128xf32>
    %44 = tpu.matmul %43, %9, %cst_17 {dimension_numbers = #tpu.dot_dimension_numbers<[1], [0], [0], [1], [0, 0, 1, 1], [], []>} : vector<2x64xf32>, vector<64x128xf32>, vector<2x128xf32> -> vector<2x128xf32>
    %45 = arith.addf %44, %12 : vector<2x128xf32>
    %46 = vector.extract_strided_slice %45 {offsets = [0, 0], sizes = [2, 32], strides = [1, 1]} : vector<2x128xf32> to vector<2x32xf32>
    %47 = arith.negf %46 : vector<2x32xf32>
    %48 = math.exp %47 : vector<2x32xf32>
    %cst_18 = arith.constant 1.000000e+00 : f32
    %49 = vector.broadcast %cst_18 : f32 to vector<2x32xf32>
    %50 = arith.addf %49, %48 : vector<2x32xf32>
    %51 = arith.divf %49, %50 : vector<2x32xf32>
    %52 = vector.extract_strided_slice %45 {offsets = [0, 32], sizes = [2, 32], strides = [1, 1]} : vector<2x128xf32> to vector<2x32xf32>
    %53 = arith.negf %52 : vector<2x32xf32>
    %54 = math.exp %53 : vector<2x32xf32>
    %cst_19 = arith.constant 1.000000e+00 : f32
    %55 = vector.broadcast %cst_19 : f32 to vector<2x32xf32>
    %56 = arith.addf %55, %54 : vector<2x32xf32>
    %57 = arith.divf %55, %56 : vector<2x32xf32>
    %58 = vector.extract_strided_slice %45 {offsets = [0, 64], sizes = [2, 32], strides = [1, 1]} : vector<2x128xf32> to vector<2x32xf32>
    %59 = math.tanh %58 : vector<2x32xf32>
    %60 = vector.extract_strided_slice %45 {offsets = [0, 96], sizes = [2, 32], strides = [1, 1]} : vector<2x128xf32> to vector<2x32xf32>
    %61 = arith.negf %60 : vector<2x32xf32>
    %62 = math.exp %61 : vector<2x32xf32>
    %cst_20 = arith.constant 1.000000e+00 : f32
    %63 = vector.broadcast %cst_20 : f32 to vector<2x32xf32>
    %64 = arith.addf %63, %62 : vector<2x32xf32>
    %65 = arith.divf %63, %64 : vector<2x32xf32>
    %66 = arith.mulf %57, %13 : vector<2x32xf32>
    %67 = arith.mulf %51, %59 : vector<2x32xf32>
    %68 = arith.addf %66, %67 : vector<2x32xf32>
    %69 = math.tanh %68 : vector<2x32xf32>
    %70 = arith.mulf %65, %69 : vector<2x32xf32>
    %71 = vector.extract_strided_slice %7 {offsets = [1, 0, 0], sizes = [1, 2, 128], strides = [1, 1, 1]} : vector<8x2x128xf32> to vector<1x2x128xf32>
    %72 = vector.shape_cast %71 : vector<1x2x128xf32> to vector<2x128xf32>
    %cst_21 = arith.constant dense<0.000000e+00> : vector<2x128xf32>
    %73 = tpu.matmul %42, %8, %cst_21 {dimension_numbers = #tpu.dot_dimension_numbers<[1], [0], [0], [1], [0, 0, 1, 1], [], []>} : vector<2x32xf32>, vector<32x128xf32>, vector<2x128xf32> -> vector<2x128xf32>
    %74 = arith.addf %72, %73 : vector<2x128xf32>
    %75 = vector.extract_strided_slice %74 {offsets = [0, 0], sizes = [2, 32], strides = [1, 1]} : vector<2x128xf32> to vector<2x32xf32>
    %76 = arith.negf %75 : vector<2x32xf32>
    %77 = math.exp %76 : vector<2x32xf32>
    %cst_22 = arith.constant 1.000000e+00 : f32
    %78 = vector.broadcast %cst_22 : f32 to vector<2x32xf32>
    %79 = arith.addf %78, %77 : vector<2x32xf32>
    %80 = arith.divf %78, %79 : vector<2x32xf32>
    %81 = vector.extract_strided_slice %74 {offsets = [0, 32], sizes = [2, 32], strides = [1, 1]} : vector<2x128xf32> to vector<2x32xf32>
    %82 = arith.negf %81 : vector<2x32xf32>
    %83 = math.exp %82 : vector<2x32xf32>
    %cst_23 = arith.constant 1.000000e+00 : f32
    %84 = vector.broadcast %cst_23 : f32 to vector<2x32xf32>
    %85 = arith.addf %84, %83 : vector<2x32xf32>
    %86 = arith.divf %84, %85 : vector<2x32xf32>
    %87 = vector.extract_strided_slice %74 {offsets = [0, 64], sizes = [2, 32], strides = [1, 1]} : vector<2x128xf32> to vector<2x32xf32>
    %88 = math.tanh %87 : vector<2x32xf32>
    %89 = vector.extract_strided_slice %74 {offsets = [0, 96], sizes = [2, 32], strides = [1, 1]} : vector<2x128xf32> to vector<2x32xf32>
    %90 = arith.negf %89 : vector<2x32xf32>
    %91 = math.exp %90 : vector<2x32xf32>
    %cst_24 = arith.constant 1.000000e+00 : f32
    %92 = vector.broadcast %cst_24 : f32 to vector<2x32xf32>
    %93 = arith.addf %92, %91 : vector<2x32xf32>
    %94 = arith.divf %92, %93 : vector<2x32xf32>
    %95 = arith.mulf %86, %40 : vector<2x32xf32>
    %96 = arith.mulf %80, %88 : vector<2x32xf32>
    %97 = arith.addf %95, %96 : vector<2x32xf32>
    %98 = math.tanh %97 : vector<2x32xf32>
    %99 = arith.mulf %94, %98 : vector<2x32xf32>
    %100 = tpu.concatenate %99, %70 in 1 : vector<2x32xf32>, vector<2x32xf32> -> vector<2x64xf32>
    %cst_25 = arith.constant dense<0.000000e+00> : vector<2x128xf32>
    %101 = tpu.matmul %100, %9, %cst_25 {dimension_numbers = #tpu.dot_dimension_numbers<[1], [0], [0], [1], [0, 0, 1, 1], [], []>} : vector<2x64xf32>, vector<64x128xf32>, vector<2x128xf32> -> vector<2x128xf32>
    %102 = arith.addf %101, %12 : vector<2x128xf32>
    %103 = vector.extract_strided_slice %102 {offsets = [0, 0], sizes = [2, 32], strides = [1, 1]} : vector<2x128xf32> to vector<2x32xf32>
    %104 = arith.negf %103 : vector<2x32xf32>
    %105 = math.exp %104 : vector<2x32xf32>
    %cst_26 = arith.constant 1.000000e+00 : f32
    %106 = vector.broadcast %cst_26 : f32 to vector<2x32xf32>
    %107 = arith.addf %106, %105 : vector<2x32xf32>
    %108 = arith.divf %106, %107 : vector<2x32xf32>
    %109 = vector.extract_strided_slice %102 {offsets = [0, 32], sizes = [2, 32], strides = [1, 1]} : vector<2x128xf32> to vector<2x32xf32>
    %110 = arith.negf %109 : vector<2x32xf32>
    %111 = math.exp %110 : vector<2x32xf32>
    %cst_27 = arith.constant 1.000000e+00 : f32
    %112 = vector.broadcast %cst_27 : f32 to vector<2x32xf32>
    %113 = arith.addf %112, %111 : vector<2x32xf32>
    %114 = arith.divf %112, %113 : vector<2x32xf32>
    %115 = vector.extract_strided_slice %102 {offsets = [0, 64], sizes = [2, 32], strides = [1, 1]} : vector<2x128xf32> to vector<2x32xf32>
    %116 = math.tanh %115 : vector<2x32xf32>
    %117 = vector.extract_strided_slice %102 {offsets = [0, 96], sizes = [2, 32], strides = [1, 1]} : vector<2x128xf32> to vector<2x32xf32>
    %118 = arith.negf %117 : vector<2x32xf32>
    %119 = math.exp %118 : vector<2x32xf32>
    %cst_28 = arith.constant 1.000000e+00 : f32
    %120 = vector.broadcast %cst_28 : f32 to vector<2x32xf32>
    %121 = arith.addf %120, %119 : vector<2x32xf32>
    %122 = arith.divf %120, %121 : vector<2x32xf32>
    %123 = arith.mulf %114, %68 : vector<2x32xf32>
    %124 = arith.mulf %108, %116 : vector<2x32xf32>
    %125 = arith.addf %123, %124 : vector<2x32xf32>
    %126 = math.tanh %125 : vector<2x32xf32>
    %127 = arith.mulf %122, %126 : vector<2x32xf32>
    %128 = vector.extract_strided_slice %7 {offsets = [2, 0, 0], sizes = [1, 2, 128], strides = [1, 1, 1]} : vector<8x2x128xf32> to vector<1x2x128xf32>
    %129 = vector.shape_cast %128 : vector<1x2x128xf32> to vector<2x128xf32>
    %cst_29 = arith.constant dense<0.000000e+00> : vector<2x128xf32>
    %130 = tpu.matmul %99, %8, %cst_29 {dimension_numbers = #tpu.dot_dimension_numbers<[1], [0], [0], [1], [0, 0, 1, 1], [], []>} : vector<2x32xf32>, vector<32x128xf32>, vector<2x128xf32> -> vector<2x128xf32>
    %131 = arith.addf %129, %130 : vector<2x128xf32>
    %132 = vector.extract_strided_slice %131 {offsets = [0, 0], sizes = [2, 32], strides = [1, 1]} : vector<2x128xf32> to vector<2x32xf32>
    %133 = arith.negf %132 : vector<2x32xf32>
    %134 = math.exp %133 : vector<2x32xf32>
    %cst_30 = arith.constant 1.000000e+00 : f32
    %135 = vector.broadcast %cst_30 : f32 to vector<2x32xf32>
    %136 = arith.addf %135, %134 : vector<2x32xf32>
    %137 = arith.divf %135, %136 : vector<2x32xf32>
    %138 = vector.extract_strided_slice %131 {offsets = [0, 32], sizes = [2, 32], strides = [1, 1]} : vector<2x128xf32> to vector<2x32xf32>
    %139 = arith.negf %138 : vector<2x32xf32>
    %140 = math.exp %139 : vector<2x32xf32>
    %cst_31 = arith.constant 1.000000e+00 : f32
    %141 = vector.broadcast %cst_31 : f32 to vector<2x32xf32>
    %142 = arith.addf %141, %140 : vector<2x32xf32>
    %143 = arith.divf %141, %142 : vector<2x32xf32>
    %144 = vector.extract_strided_slice %131 {offsets = [0, 64], sizes = [2, 32], strides = [1, 1]} : vector<2x128xf32> to vector<2x32xf32>
    %145 = math.tanh %144 : vector<2x32xf32>
    %146 = vector.extract_strided_slice %131 {offsets = [0, 96], sizes = [2, 32], strides = [1, 1]} : vector<2x128xf32> to vector<2x32xf32>
    %147 = arith.negf %146 : vector<2x32xf32>
    %148 = math.exp %147 : vector<2x32xf32>
    %cst_32 = arith.constant 1.000000e+00 : f32
    %149 = vector.broadcast %cst_32 : f32 to vector<2x32xf32>
    %150 = arith.addf %149, %148 : vector<2x32xf32>
    %151 = arith.divf %149, %150 : vector<2x32xf32>
    %152 = arith.mulf %143, %97 : vector<2x32xf32>
    %153 = arith.mulf %137, %145 : vector<2x32xf32>
    %154 = arith.addf %152, %153 : vector<2x32xf32>
    %155 = math.tanh %154 : vector<2x32xf32>
    %156 = arith.mulf %151, %155 : vector<2x32xf32>
    %157 = tpu.concatenate %156, %127 in 1 : vector<2x32xf32>, vector<2x32xf32> -> vector<2x64xf32>
    %cst_33 = arith.constant dense<0.000000e+00> : vector<2x128xf32>
    %158 = tpu.matmul %157, %9, %cst_33 {dimension_numbers = #tpu.dot_dimension_numbers<[1], [0], [0], [1], [0, 0, 1, 1], [], []>} : vector<2x64xf32>, vector<64x128xf32>, vector<2x128xf32> -> vector<2x128xf32>
    %159 = arith.addf %158, %12 : vector<2x128xf32>
    %160 = vector.extract_strided_slice %159 {offsets = [0, 0], sizes = [2, 32], strides = [1, 1]} : vector<2x128xf32> to vector<2x32xf32>
    %161 = arith.negf %160 : vector<2x32xf32>
    %162 = math.exp %161 : vector<2x32xf32>
    %cst_34 = arith.constant 1.000000e+00 : f32
    %163 = vector.broadcast %cst_34 : f32 to vector<2x32xf32>
    %164 = arith.addf %163, %162 : vector<2x32xf32>
    %165 = arith.divf %163, %164 : vector<2x32xf32>
    %166 = vector.extract_strided_slice %159 {offsets = [0, 32], sizes = [2, 32], strides = [1, 1]} : vector<2x128xf32> to vector<2x32xf32>
    %167 = arith.negf %166 : vector<2x32xf32>
    %168 = math.exp %167 : vector<2x32xf32>
    %cst_35 = arith.constant 1.000000e+00 : f32
    %169 = vector.broadcast %cst_35 : f32 to vector<2x32xf32>
    %170 = arith.addf %169, %168 : vector<2x32xf32>
    %171 = arith.divf %169, %170 : vector<2x32xf32>
    %172 = vector.extract_strided_slice %159 {offsets = [0, 64], sizes = [2, 32], strides = [1, 1]} : vector<2x128xf32> to vector<2x32xf32>
    %173 = math.tanh %172 : vector<2x32xf32>
    %174 = vector.extract_strided_slice %159 {offsets = [0, 96], sizes = [2, 32], strides = [1, 1]} : vector<2x128xf32> to vector<2x32xf32>
    %175 = arith.negf %174 : vector<2x32xf32>
    %176 = math.exp %175 : vector<2x32xf32>
    %cst_36 = arith.constant 1.000000e+00 : f32
    %177 = vector.broadcast %cst_36 : f32 to vector<2x32xf32>
    %178 = arith.addf %177, %176 : vector<2x32xf32>
    %179 = arith.divf %177, %178 : vector<2x32xf32>
    %180 = arith.mulf %171, %125 : vector<2x32xf32>
    %181 = arith.mulf %165, %173 : vector<2x32xf32>
    %182 = arith.addf %180, %181 : vector<2x32xf32>
    %183 = math.tanh %182 : vector<2x32xf32>
    %184 = arith.mulf %179, %183 : vector<2x32xf32>
    %185 = vector.extract_strided_slice %7 {offsets = [3, 0, 0], sizes = [1, 2, 128], strides = [1, 1, 1]} : vector<8x2x128xf32> to vector<1x2x128xf32>
    %186 = vector.shape_cast %185 : vector<1x2x128xf32> to vector<2x128xf32>
    %cst_37 = arith.constant dense<0.000000e+00> : vector<2x128xf32>
    %187 = tpu.matmul %156, %8, %cst_37 {dimension_numbers = #tpu.dot_dimension_numbers<[1], [0], [0], [1], [0, 0, 1, 1], [], []>} : vector<2x32xf32>, vector<32x128xf32>, vector<2x128xf32> -> vector<2x128xf32>
    %188 = arith.addf %186, %187 : vector<2x128xf32>
    %189 = vector.extract_strided_slice %188 {offsets = [0, 0], sizes = [2, 32], strides = [1, 1]} : vector<2x128xf32> to vector<2x32xf32>
    %190 = arith.negf %189 : vector<2x32xf32>
    %191 = math.exp %190 : vector<2x32xf32>
    %cst_38 = arith.constant 1.000000e+00 : f32
    %192 = vector.broadcast %cst_38 : f32 to vector<2x32xf32>
    %193 = arith.addf %192, %191 : vector<2x32xf32>
    %194 = arith.divf %192, %193 : vector<2x32xf32>
    %195 = vector.extract_strided_slice %188 {offsets = [0, 32], sizes = [2, 32], strides = [1, 1]} : vector<2x128xf32> to vector<2x32xf32>
    %196 = arith.negf %195 : vector<2x32xf32>
    %197 = math.exp %196 : vector<2x32xf32>
    %cst_39 = arith.constant 1.000000e+00 : f32
    %198 = vector.broadcast %cst_39 : f32 to vector<2x32xf32>
    %199 = arith.addf %198, %197 : vector<2x32xf32>
    %200 = arith.divf %198, %199 : vector<2x32xf32>
    %201 = vector.extract_strided_slice %188 {offsets = [0, 64], sizes = [2, 32], strides = [1, 1]} : vector<2x128xf32> to vector<2x32xf32>
    %202 = math.tanh %201 : vector<2x32xf32>
    %203 = vector.extract_strided_slice %188 {offsets = [0, 96], sizes = [2, 32], strides = [1, 1]} : vector<2x128xf32> to vector<2x32xf32>
    %204 = arith.negf %203 : vector<2x32xf32>
    %205 = math.exp %204 : vector<2x32xf32>
    %cst_40 = arith.constant 1.000000e+00 : f32
    %206 = vector.broadcast %cst_40 : f32 to vector<2x32xf32>
    %207 = arith.addf %206, %205 : vector<2x32xf32>
    %208 = arith.divf %206, %207 : vector<2x32xf32>
    %209 = arith.mulf %200, %154 : vector<2x32xf32>
    %210 = arith.mulf %194, %202 : vector<2x32xf32>
    %211 = arith.addf %209, %210 : vector<2x32xf32>
    %212 = math.tanh %211 : vector<2x32xf32>
    %213 = arith.mulf %208, %212 : vector<2x32xf32>
    %214 = tpu.concatenate %213, %184 in 1 : vector<2x32xf32>, vector<2x32xf32> -> vector<2x64xf32>
    %cst_41 = arith.constant dense<0.000000e+00> : vector<2x128xf32>
    %215 = tpu.matmul %214, %9, %cst_41 {dimension_numbers = #tpu.dot_dimension_numbers<[1], [0], [0], [1], [0, 0, 1, 1], [], []>} : vector<2x64xf32>, vector<64x128xf32>, vector<2x128xf32> -> vector<2x128xf32>
    %216 = arith.addf %215, %12 : vector<2x128xf32>
    %217 = vector.extract_strided_slice %216 {offsets = [0, 0], sizes = [2, 32], strides = [1, 1]} : vector<2x128xf32> to vector<2x32xf32>
    %218 = arith.negf %217 : vector<2x32xf32>
    %219 = math.exp %218 : vector<2x32xf32>
    %cst_42 = arith.constant 1.000000e+00 : f32
    %220 = vector.broadcast %cst_42 : f32 to vector<2x32xf32>
    %221 = arith.addf %220, %219 : vector<2x32xf32>
    %222 = arith.divf %220, %221 : vector<2x32xf32>
    %223 = vector.extract_strided_slice %216 {offsets = [0, 32], sizes = [2, 32], strides = [1, 1]} : vector<2x128xf32> to vector<2x32xf32>
    %224 = arith.negf %223 : vector<2x32xf32>
    %225 = math.exp %224 : vector<2x32xf32>
    %cst_43 = arith.constant 1.000000e+00 : f32
    %226 = vector.broadcast %cst_43 : f32 to vector<2x32xf32>
    %227 = arith.addf %226, %225 : vector<2x32xf32>
    %228 = arith.divf %226, %227 : vector<2x32xf32>
    %229 = vector.extract_strided_slice %216 {offsets = [0, 64], sizes = [2, 32], strides = [1, 1]} : vector<2x128xf32> to vector<2x32xf32>
    %230 = math.tanh %229 : vector<2x32xf32>
    %231 = vector.extract_strided_slice %216 {offsets = [0, 96], sizes = [2, 32], strides = [1, 1]} : vector<2x128xf32> to vector<2x32xf32>
    %232 = arith.negf %231 : vector<2x32xf32>
    %233 = math.exp %232 : vector<2x32xf32>
    %cst_44 = arith.constant 1.000000e+00 : f32
    %234 = vector.broadcast %cst_44 : f32 to vector<2x32xf32>
    %235 = arith.addf %234, %233 : vector<2x32xf32>
    %236 = arith.divf %234, %235 : vector<2x32xf32>
    %237 = arith.mulf %228, %182 : vector<2x32xf32>
    %238 = arith.mulf %222, %230 : vector<2x32xf32>
    %239 = arith.addf %237, %238 : vector<2x32xf32>
    %240 = math.tanh %239 : vector<2x32xf32>
    %241 = arith.mulf %236, %240 : vector<2x32xf32>
    %242 = vector.extract_strided_slice %7 {offsets = [4, 0, 0], sizes = [1, 2, 128], strides = [1, 1, 1]} : vector<8x2x128xf32> to vector<1x2x128xf32>
    %243 = vector.shape_cast %242 : vector<1x2x128xf32> to vector<2x128xf32>
    %cst_45 = arith.constant dense<0.000000e+00> : vector<2x128xf32>
    %244 = tpu.matmul %213, %8, %cst_45 {dimension_numbers = #tpu.dot_dimension_numbers<[1], [0], [0], [1], [0, 0, 1, 1], [], []>} : vector<2x32xf32>, vector<32x128xf32>, vector<2x128xf32> -> vector<2x128xf32>
    %245 = arith.addf %243, %244 : vector<2x128xf32>
    %246 = vector.extract_strided_slice %245 {offsets = [0, 0], sizes = [2, 32], strides = [1, 1]} : vector<2x128xf32> to vector<2x32xf32>
    %247 = arith.negf %246 : vector<2x32xf32>
    %248 = math.exp %247 : vector<2x32xf32>
    %cst_46 = arith.constant 1.000000e+00 : f32
    %249 = vector.broadcast %cst_46 : f32 to vector<2x32xf32>
    %250 = arith.addf %249, %248 : vector<2x32xf32>
    %251 = arith.divf %249, %250 : vector<2x32xf32>
    %252 = vector.extract_strided_slice %245 {offsets = [0, 32], sizes = [2, 32], strides = [1, 1]} : vector<2x128xf32> to vector<2x32xf32>
    %253 = arith.negf %252 : vector<2x32xf32>
    %254 = math.exp %253 : vector<2x32xf32>
    %cst_47 = arith.constant 1.000000e+00 : f32
    %255 = vector.broadcast %cst_47 : f32 to vector<2x32xf32>
    %256 = arith.addf %255, %254 : vector<2x32xf32>
    %257 = arith.divf %255, %256 : vector<2x32xf32>
    %258 = vector.extract_strided_slice %245 {offsets = [0, 64], sizes = [2, 32], strides = [1, 1]} : vector<2x128xf32> to vector<2x32xf32>
    %259 = math.tanh %258 : vector<2x32xf32>
    %260 = vector.extract_strided_slice %245 {offsets = [0, 96], sizes = [2, 32], strides = [1, 1]} : vector<2x128xf32> to vector<2x32xf32>
    %261 = arith.negf %260 : vector<2x32xf32>
    %262 = math.exp %261 : vector<2x32xf32>
    %cst_48 = arith.constant 1.000000e+00 : f32
    %263 = vector.broadcast %cst_48 : f32 to vector<2x32xf32>
    %264 = arith.addf %263, %262 : vector<2x32xf32>
    %265 = arith.divf %263, %264 : vector<2x32xf32>
    %266 = arith.mulf %257, %211 : vector<2x32xf32>
    %267 = arith.mulf %251, %259 : vector<2x32xf32>
    %268 = arith.addf %266, %267 : vector<2x32xf32>
    %269 = math.tanh %268 : vector<2x32xf32>
    %270 = arith.mulf %265, %269 : vector<2x32xf32>
    %271 = tpu.concatenate %270, %241 in 1 : vector<2x32xf32>, vector<2x32xf32> -> vector<2x64xf32>
    %cst_49 = arith.constant dense<0.000000e+00> : vector<2x128xf32>
    %272 = tpu.matmul %271, %9, %cst_49 {dimension_numbers = #tpu.dot_dimension_numbers<[1], [0], [0], [1], [0, 0, 1, 1], [], []>} : vector<2x64xf32>, vector<64x128xf32>, vector<2x128xf32> -> vector<2x128xf32>
    %273 = arith.addf %272, %12 : vector<2x128xf32>
    %274 = vector.extract_strided_slice %273 {offsets = [0, 0], sizes = [2, 32], strides = [1, 1]} : vector<2x128xf32> to vector<2x32xf32>
    %275 = arith.negf %274 : vector<2x32xf32>
    %276 = math.exp %275 : vector<2x32xf32>
    %cst_50 = arith.constant 1.000000e+00 : f32
    %277 = vector.broadcast %cst_50 : f32 to vector<2x32xf32>
    %278 = arith.addf %277, %276 : vector<2x32xf32>
    %279 = arith.divf %277, %278 : vector<2x32xf32>
    %280 = vector.extract_strided_slice %273 {offsets = [0, 32], sizes = [2, 32], strides = [1, 1]} : vector<2x128xf32> to vector<2x32xf32>
    %281 = arith.negf %280 : vector<2x32xf32>
    %282 = math.exp %281 : vector<2x32xf32>
    %cst_51 = arith.constant 1.000000e+00 : f32
    %283 = vector.broadcast %cst_51 : f32 to vector<2x32xf32>
    %284 = arith.addf %283, %282 : vector<2x32xf32>
    %285 = arith.divf %283, %284 : vector<2x32xf32>
    %286 = vector.extract_strided_slice %273 {offsets = [0, 64], sizes = [2, 32], strides = [1, 1]} : vector<2x128xf32> to vector<2x32xf32>
    %287 = math.tanh %286 : vector<2x32xf32>
    %288 = vector.extract_strided_slice %273 {offsets = [0, 96], sizes = [2, 32], strides = [1, 1]} : vector<2x128xf32> to vector<2x32xf32>
    %289 = arith.negf %288 : vector<2x32xf32>
    %290 = math.exp %289 : vector<2x32xf32>
    %cst_52 = arith.constant 1.000000e+00 : f32
    %291 = vector.broadcast %cst_52 : f32 to vector<2x32xf32>
    %292 = arith.addf %291, %290 : vector<2x32xf32>
    %293 = arith.divf %291, %292 : vector<2x32xf32>
    %294 = arith.mulf %285, %239 : vector<2x32xf32>
    %295 = arith.mulf %279, %287 : vector<2x32xf32>
    %296 = arith.addf %294, %295 : vector<2x32xf32>
    %297 = math.tanh %296 : vector<2x32xf32>
    %298 = arith.mulf %293, %297 : vector<2x32xf32>
    %299 = vector.extract_strided_slice %7 {offsets = [5, 0, 0], sizes = [1, 2, 128], strides = [1, 1, 1]} : vector<8x2x128xf32> to vector<1x2x128xf32>
    %300 = vector.shape_cast %299 : vector<1x2x128xf32> to vector<2x128xf32>
    %cst_53 = arith.constant dense<0.000000e+00> : vector<2x128xf32>
    %301 = tpu.matmul %270, %8, %cst_53 {dimension_numbers = #tpu.dot_dimension_numbers<[1], [0], [0], [1], [0, 0, 1, 1], [], []>} : vector<2x32xf32>, vector<32x128xf32>, vector<2x128xf32> -> vector<2x128xf32>
    %302 = arith.addf %300, %301 : vector<2x128xf32>
    %303 = vector.extract_strided_slice %302 {offsets = [0, 0], sizes = [2, 32], strides = [1, 1]} : vector<2x128xf32> to vector<2x32xf32>
    %304 = arith.negf %303 : vector<2x32xf32>
    %305 = math.exp %304 : vector<2x32xf32>
    %cst_54 = arith.constant 1.000000e+00 : f32
    %306 = vector.broadcast %cst_54 : f32 to vector<2x32xf32>
    %307 = arith.addf %306, %305 : vector<2x32xf32>
    %308 = arith.divf %306, %307 : vector<2x32xf32>
    %309 = vector.extract_strided_slice %302 {offsets = [0, 32], sizes = [2, 32], strides = [1, 1]} : vector<2x128xf32> to vector<2x32xf32>
    %310 = arith.negf %309 : vector<2x32xf32>
    %311 = math.exp %310 : vector<2x32xf32>
    %cst_55 = arith.constant 1.000000e+00 : f32
    %312 = vector.broadcast %cst_55 : f32 to vector<2x32xf32>
    %313 = arith.addf %312, %311 : vector<2x32xf32>
    %314 = arith.divf %312, %313 : vector<2x32xf32>
    %315 = vector.extract_strided_slice %302 {offsets = [0, 64], sizes = [2, 32], strides = [1, 1]} : vector<2x128xf32> to vector<2x32xf32>
    %316 = math.tanh %315 : vector<2x32xf32>
    %317 = vector.extract_strided_slice %302 {offsets = [0, 96], sizes = [2, 32], strides = [1, 1]} : vector<2x128xf32> to vector<2x32xf32>
    %318 = arith.negf %317 : vector<2x32xf32>
    %319 = math.exp %318 : vector<2x32xf32>
    %cst_56 = arith.constant 1.000000e+00 : f32
    %320 = vector.broadcast %cst_56 : f32 to vector<2x32xf32>
    %321 = arith.addf %320, %319 : vector<2x32xf32>
    %322 = arith.divf %320, %321 : vector<2x32xf32>
    %323 = arith.mulf %314, %268 : vector<2x32xf32>
    %324 = arith.mulf %308, %316 : vector<2x32xf32>
    %325 = arith.addf %323, %324 : vector<2x32xf32>
    %326 = math.tanh %325 : vector<2x32xf32>
    %327 = arith.mulf %322, %326 : vector<2x32xf32>
    %328 = tpu.concatenate %327, %298 in 1 : vector<2x32xf32>, vector<2x32xf32> -> vector<2x64xf32>
    %cst_57 = arith.constant dense<0.000000e+00> : vector<2x128xf32>
    %329 = tpu.matmul %328, %9, %cst_57 {dimension_numbers = #tpu.dot_dimension_numbers<[1], [0], [0], [1], [0, 0, 1, 1], [], []>} : vector<2x64xf32>, vector<64x128xf32>, vector<2x128xf32> -> vector<2x128xf32>
    %330 = arith.addf %329, %12 : vector<2x128xf32>
    %331 = vector.extract_strided_slice %330 {offsets = [0, 0], sizes = [2, 32], strides = [1, 1]} : vector<2x128xf32> to vector<2x32xf32>
    %332 = arith.negf %331 : vector<2x32xf32>
    %333 = math.exp %332 : vector<2x32xf32>
    %cst_58 = arith.constant 1.000000e+00 : f32
    %334 = vector.broadcast %cst_58 : f32 to vector<2x32xf32>
    %335 = arith.addf %334, %333 : vector<2x32xf32>
    %336 = arith.divf %334, %335 : vector<2x32xf32>
    %337 = vector.extract_strided_slice %330 {offsets = [0, 32], sizes = [2, 32], strides = [1, 1]} : vector<2x128xf32> to vector<2x32xf32>
    %338 = arith.negf %337 : vector<2x32xf32>
    %339 = math.exp %338 : vector<2x32xf32>
    %cst_59 = arith.constant 1.000000e+00 : f32
    %340 = vector.broadcast %cst_59 : f32 to vector<2x32xf32>
    %341 = arith.addf %340, %339 : vector<2x32xf32>
    %342 = arith.divf %340, %341 : vector<2x32xf32>
    %343 = vector.extract_strided_slice %330 {offsets = [0, 64], sizes = [2, 32], strides = [1, 1]} : vector<2x128xf32> to vector<2x32xf32>
    %344 = math.tanh %343 : vector<2x32xf32>
    %345 = vector.extract_strided_slice %330 {offsets = [0, 96], sizes = [2, 32], strides = [1, 1]} : vector<2x128xf32> to vector<2x32xf32>
    %346 = arith.negf %345 : vector<2x32xf32>
    %347 = math.exp %346 : vector<2x32xf32>
    %cst_60 = arith.constant 1.000000e+00 : f32
    %348 = vector.broadcast %cst_60 : f32 to vector<2x32xf32>
    %349 = arith.addf %348, %347 : vector<2x32xf32>
    %350 = arith.divf %348, %349 : vector<2x32xf32>
    %351 = arith.mulf %342, %296 : vector<2x32xf32>
    %352 = arith.mulf %336, %344 : vector<2x32xf32>
    %353 = arith.addf %351, %352 : vector<2x32xf32>
    %354 = math.tanh %353 : vector<2x32xf32>
    %355 = arith.mulf %350, %354 : vector<2x32xf32>
    %356 = vector.extract_strided_slice %7 {offsets = [6, 0, 0], sizes = [1, 2, 128], strides = [1, 1, 1]} : vector<8x2x128xf32> to vector<1x2x128xf32>
    %357 = vector.shape_cast %356 : vector<1x2x128xf32> to vector<2x128xf32>
    %cst_61 = arith.constant dense<0.000000e+00> : vector<2x128xf32>
    %358 = tpu.matmul %327, %8, %cst_61 {dimension_numbers = #tpu.dot_dimension_numbers<[1], [0], [0], [1], [0, 0, 1, 1], [], []>} : vector<2x32xf32>, vector<32x128xf32>, vector<2x128xf32> -> vector<2x128xf32>
    %359 = arith.addf %357, %358 : vector<2x128xf32>
    %360 = vector.extract_strided_slice %359 {offsets = [0, 0], sizes = [2, 32], strides = [1, 1]} : vector<2x128xf32> to vector<2x32xf32>
    %361 = arith.negf %360 : vector<2x32xf32>
    %362 = math.exp %361 : vector<2x32xf32>
    %cst_62 = arith.constant 1.000000e+00 : f32
    %363 = vector.broadcast %cst_62 : f32 to vector<2x32xf32>
    %364 = arith.addf %363, %362 : vector<2x32xf32>
    %365 = arith.divf %363, %364 : vector<2x32xf32>
    %366 = vector.extract_strided_slice %359 {offsets = [0, 32], sizes = [2, 32], strides = [1, 1]} : vector<2x128xf32> to vector<2x32xf32>
    %367 = arith.negf %366 : vector<2x32xf32>
    %368 = math.exp %367 : vector<2x32xf32>
    %cst_63 = arith.constant 1.000000e+00 : f32
    %369 = vector.broadcast %cst_63 : f32 to vector<2x32xf32>
    %370 = arith.addf %369, %368 : vector<2x32xf32>
    %371 = arith.divf %369, %370 : vector<2x32xf32>
    %372 = vector.extract_strided_slice %359 {offsets = [0, 64], sizes = [2, 32], strides = [1, 1]} : vector<2x128xf32> to vector<2x32xf32>
    %373 = math.tanh %372 : vector<2x32xf32>
    %374 = vector.extract_strided_slice %359 {offsets = [0, 96], sizes = [2, 32], strides = [1, 1]} : vector<2x128xf32> to vector<2x32xf32>
    %375 = arith.negf %374 : vector<2x32xf32>
    %376 = math.exp %375 : vector<2x32xf32>
    %cst_64 = arith.constant 1.000000e+00 : f32
    %377 = vector.broadcast %cst_64 : f32 to vector<2x32xf32>
    %378 = arith.addf %377, %376 : vector<2x32xf32>
    %379 = arith.divf %377, %378 : vector<2x32xf32>
    %380 = arith.mulf %371, %325 : vector<2x32xf32>
    %381 = arith.mulf %365, %373 : vector<2x32xf32>
    %382 = arith.addf %380, %381 : vector<2x32xf32>
    %383 = math.tanh %382 : vector<2x32xf32>
    %384 = arith.mulf %379, %383 : vector<2x32xf32>
    %385 = tpu.concatenate %384, %355 in 1 : vector<2x32xf32>, vector<2x32xf32> -> vector<2x64xf32>
    %cst_65 = arith.constant dense<0.000000e+00> : vector<2x128xf32>
    %386 = tpu.matmul %385, %9, %cst_65 {dimension_numbers = #tpu.dot_dimension_numbers<[1], [0], [0], [1], [0, 0, 1, 1], [], []>} : vector<2x64xf32>, vector<64x128xf32>, vector<2x128xf32> -> vector<2x128xf32>
    %387 = arith.addf %386, %12 : vector<2x128xf32>
    %388 = vector.extract_strided_slice %387 {offsets = [0, 0], sizes = [2, 32], strides = [1, 1]} : vector<2x128xf32> to vector<2x32xf32>
    %389 = arith.negf %388 : vector<2x32xf32>
    %390 = math.exp %389 : vector<2x32xf32>
    %cst_66 = arith.constant 1.000000e+00 : f32
    %391 = vector.broadcast %cst_66 : f32 to vector<2x32xf32>
    %392 = arith.addf %391, %390 : vector<2x32xf32>
    %393 = arith.divf %391, %392 : vector<2x32xf32>
    %394 = vector.extract_strided_slice %387 {offsets = [0, 32], sizes = [2, 32], strides = [1, 1]} : vector<2x128xf32> to vector<2x32xf32>
    %395 = arith.negf %394 : vector<2x32xf32>
    %396 = math.exp %395 : vector<2x32xf32>
    %cst_67 = arith.constant 1.000000e+00 : f32
    %397 = vector.broadcast %cst_67 : f32 to vector<2x32xf32>
    %398 = arith.addf %397, %396 : vector<2x32xf32>
    %399 = arith.divf %397, %398 : vector<2x32xf32>
    %400 = vector.extract_strided_slice %387 {offsets = [0, 64], sizes = [2, 32], strides = [1, 1]} : vector<2x128xf32> to vector<2x32xf32>
    %401 = math.tanh %400 : vector<2x32xf32>
    %402 = vector.extract_strided_slice %387 {offsets = [0, 96], sizes = [2, 32], strides = [1, 1]} : vector<2x128xf32> to vector<2x32xf32>
    %403 = arith.negf %402 : vector<2x32xf32>
    %404 = math.exp %403 : vector<2x32xf32>
    %cst_68 = arith.constant 1.000000e+00 : f32
    %405 = vector.broadcast %cst_68 : f32 to vector<2x32xf32>
    %406 = arith.addf %405, %404 : vector<2x32xf32>
    %407 = arith.divf %405, %406 : vector<2x32xf32>
    %408 = arith.mulf %399, %353 : vector<2x32xf32>
    %409 = arith.mulf %393, %401 : vector<2x32xf32>
    %410 = arith.addf %408, %409 : vector<2x32xf32>
    %411 = math.tanh %410 : vector<2x32xf32>
    %412 = arith.mulf %407, %411 : vector<2x32xf32>
    %413 = vector.extract_strided_slice %7 {offsets = [7, 0, 0], sizes = [1, 2, 128], strides = [1, 1, 1]} : vector<8x2x128xf32> to vector<1x2x128xf32>
    %414 = vector.shape_cast %413 : vector<1x2x128xf32> to vector<2x128xf32>
    %cst_69 = arith.constant dense<0.000000e+00> : vector<2x128xf32>
    %415 = tpu.matmul %384, %8, %cst_69 {dimension_numbers = #tpu.dot_dimension_numbers<[1], [0], [0], [1], [0, 0, 1, 1], [], []>} : vector<2x32xf32>, vector<32x128xf32>, vector<2x128xf32> -> vector<2x128xf32>
    %416 = arith.addf %414, %415 : vector<2x128xf32>
    %417 = vector.extract_strided_slice %416 {offsets = [0, 0], sizes = [2, 32], strides = [1, 1]} : vector<2x128xf32> to vector<2x32xf32>
    %418 = arith.negf %417 : vector<2x32xf32>
    %419 = math.exp %418 : vector<2x32xf32>
    %cst_70 = arith.constant 1.000000e+00 : f32
    %420 = vector.broadcast %cst_70 : f32 to vector<2x32xf32>
    %421 = arith.addf %420, %419 : vector<2x32xf32>
    %422 = arith.divf %420, %421 : vector<2x32xf32>
    %423 = vector.extract_strided_slice %416 {offsets = [0, 32], sizes = [2, 32], strides = [1, 1]} : vector<2x128xf32> to vector<2x32xf32>
    %424 = arith.negf %423 : vector<2x32xf32>
    %425 = math.exp %424 : vector<2x32xf32>
    %cst_71 = arith.constant 1.000000e+00 : f32
    %426 = vector.broadcast %cst_71 : f32 to vector<2x32xf32>
    %427 = arith.addf %426, %425 : vector<2x32xf32>
    %428 = arith.divf %426, %427 : vector<2x32xf32>
    %429 = vector.extract_strided_slice %416 {offsets = [0, 64], sizes = [2, 32], strides = [1, 1]} : vector<2x128xf32> to vector<2x32xf32>
    %430 = math.tanh %429 : vector<2x32xf32>
    %431 = vector.extract_strided_slice %416 {offsets = [0, 96], sizes = [2, 32], strides = [1, 1]} : vector<2x128xf32> to vector<2x32xf32>
    %432 = arith.negf %431 : vector<2x32xf32>
    %433 = math.exp %432 : vector<2x32xf32>
    %cst_72 = arith.constant 1.000000e+00 : f32
    %434 = vector.broadcast %cst_72 : f32 to vector<2x32xf32>
    %435 = arith.addf %434, %433 : vector<2x32xf32>
    %436 = arith.divf %434, %435 : vector<2x32xf32>
    %437 = arith.mulf %428, %382 : vector<2x32xf32>
    %438 = arith.mulf %422, %430 : vector<2x32xf32>
    %439 = arith.addf %437, %438 : vector<2x32xf32>
    %440 = math.tanh %439 : vector<2x32xf32>
    %441 = arith.mulf %436, %440 : vector<2x32xf32>
    %442 = tpu.concatenate %441, %412 in 1 : vector<2x32xf32>, vector<2x32xf32> -> vector<2x64xf32>
    %cst_73 = arith.constant dense<0.000000e+00> : vector<2x128xf32>
    %443 = tpu.matmul %442, %9, %cst_73 {dimension_numbers = #tpu.dot_dimension_numbers<[1], [0], [0], [1], [0, 0, 1, 1], [], []>} : vector<2x64xf32>, vector<64x128xf32>, vector<2x128xf32> -> vector<2x128xf32>
    %444 = arith.addf %443, %12 : vector<2x128xf32>
    %445 = vector.extract_strided_slice %444 {offsets = [0, 0], sizes = [2, 32], strides = [1, 1]} : vector<2x128xf32> to vector<2x32xf32>
    %446 = arith.negf %445 : vector<2x32xf32>
    %447 = math.exp %446 : vector<2x32xf32>
    %cst_74 = arith.constant 1.000000e+00 : f32
    %448 = vector.broadcast %cst_74 : f32 to vector<2x32xf32>
    %449 = arith.addf %448, %447 : vector<2x32xf32>
    %450 = arith.divf %448, %449 : vector<2x32xf32>
    %451 = vector.extract_strided_slice %444 {offsets = [0, 32], sizes = [2, 32], strides = [1, 1]} : vector<2x128xf32> to vector<2x32xf32>
    %452 = arith.negf %451 : vector<2x32xf32>
    %453 = math.exp %452 : vector<2x32xf32>
    %cst_75 = arith.constant 1.000000e+00 : f32
    %454 = vector.broadcast %cst_75 : f32 to vector<2x32xf32>
    %455 = arith.addf %454, %453 : vector<2x32xf32>
    %456 = arith.divf %454, %455 : vector<2x32xf32>
    %457 = vector.extract_strided_slice %444 {offsets = [0, 64], sizes = [2, 32], strides = [1, 1]} : vector<2x128xf32> to vector<2x32xf32>
    %458 = math.tanh %457 : vector<2x32xf32>
    %459 = vector.extract_strided_slice %444 {offsets = [0, 96], sizes = [2, 32], strides = [1, 1]} : vector<2x128xf32> to vector<2x32xf32>
    %460 = arith.negf %459 : vector<2x32xf32>
    %461 = math.exp %460 : vector<2x32xf32>
    %cst_76 = arith.constant 1.000000e+00 : f32
    %462 = vector.broadcast %cst_76 : f32 to vector<2x32xf32>
    %463 = arith.addf %462, %461 : vector<2x32xf32>
    %464 = arith.divf %462, %463 : vector<2x32xf32>
    %465 = arith.mulf %456, %410 : vector<2x32xf32>
    %466 = arith.mulf %450, %458 : vector<2x32xf32>
    %467 = arith.addf %465, %466 : vector<2x32xf32>
    %468 = math.tanh %467 : vector<2x32xf32>
    %469 = arith.mulf %464, %468 : vector<2x32xf32>
    %c0_77 = arith.constant 0 : index
    %c0_78 = arith.constant 0 : index
    %470 = vector.load %arg6[%c0_77, %c0_78] : memref<32x16xf32, #tpu.memory_space<vmem>>, vector<32x16xf32>
    %cst_79 = arith.constant dense<0.000000e+00> : vector<2x16xf32>
    %471 = tpu.matmul %469, %470, %cst_79 {dimension_numbers = #tpu.dot_dimension_numbers<[1], [0], [0], [1], [0, 0, 1, 1], [], []>} : vector<2x32xf32>, vector<32x16xf32>, vector<2x16xf32> -> vector<2x16xf32>
    %c0_80 = arith.constant 0 : index
    %c0_81 = arith.constant 0 : index
    %472 = vector.load %arg7[%c0_80, %c0_81] : memref<1x16xf32, #tpu.memory_space<vmem>>, vector<1x16xf32>
    %473 = vector.broadcast %472 : vector<1x16xf32> to vector<2x16xf32>
    %474 = arith.addf %471, %473 : vector<2x16xf32>
    %475 = arith.negf %474 : vector<2x16xf32>
    %476 = math.exp %475 : vector<2x16xf32>
    %cst_82 = arith.constant 1.000000e+00 : f32
    %477 = vector.broadcast %cst_82 : f32 to vector<2x16xf32>
    %478 = arith.addf %477, %476 : vector<2x16xf32>
    %479 = arith.divf %477, %478 : vector<2x16xf32>
    %c0_83 = arith.constant 0 : index
    %c0_84 = arith.constant 0 : index
    %480 = vector.load %arg8[%c0_83, %c0_84] : memref<16x40xf32, #tpu.memory_space<vmem>>, vector<16x40xf32>
    %cst_85 = arith.constant dense<0.000000e+00> : vector<2x40xf32>
    %481 = tpu.matmul %479, %480, %cst_85 {dimension_numbers = #tpu.dot_dimension_numbers<[1], [0], [0], [1], [0, 0, 1, 1], [], []>} : vector<2x16xf32>, vector<16x40xf32>, vector<2x40xf32> -> vector<2x40xf32>
    %c0_86 = arith.constant 0 : index
    %c0_87 = arith.constant 0 : index
    %482 = vector.load %arg9[%c0_86, %c0_87] : memref<1x40xf32, #tpu.memory_space<vmem>>, vector<1x40xf32>
    %483 = vector.broadcast %482 : vector<1x40xf32> to vector<2x40xf32>
    %484 = arith.addf %481, %483 : vector<2x40xf32>
    %485 = arith.negf %484 : vector<2x40xf32>
    %486 = math.exp %485 : vector<2x40xf32>
    %cst_88 = arith.constant 1.000000e+00 : f32
    %487 = vector.broadcast %cst_88 : f32 to vector<2x40xf32>
    %488 = arith.addf %487, %486 : vector<2x40xf32>
    %489 = arith.divf %487, %488 : vector<2x40xf32>
    %c0_89 = arith.constant 0 : index
    %c0_90 = arith.constant 0 : index
    %490 = vector.load %arg10[%c0_89, %c0_90] : memref<40x128xf32, #tpu.memory_space<vmem>>, vector<40x128xf32>
    %cst_91 = arith.constant dense<0.000000e+00> : vector<2x128xf32>
    %491 = tpu.matmul %489, %490, %cst_91 {dimension_numbers = #tpu.dot_dimension_numbers<[1], [0], [0], [1], [0, 0, 1, 1], [], []>} : vector<2x40xf32>, vector<40x128xf32>, vector<2x128xf32> -> vector<2x128xf32>
    %c0_92 = arith.constant 0 : index
    %c0_93 = arith.constant 0 : index
    %492 = vector.load %arg11[%c0_92, %c0_93] : memref<1x128xf32, #tpu.memory_space<vmem>>, vector<1x128xf32>
    %493 = vector.broadcast %492 : vector<1x128xf32> to vector<2x128xf32>
    %494 = arith.addf %491, %493 : vector<2x128xf32>
    %c0_94 = arith.constant 0 : index
    %c0_95 = arith.constant 0 : index
    %495 = vector.load %arg12[%c0_94, %c0_95] : memref<2x128xf32, #tpu.memory_space<vmem>>, vector<2x128xf32>
    tpu.vector_store %arg12[%c0_94, %c0_95], %494 {strides = array<i32>} : memref<2x128xf32, #tpu.memory_space<vmem>>, vector<2x128xf32>,
    return
  }
}

</mosaic_0001>

<bundles_post_ra>
// kernel: tpu_custom_call.1
= control target key start
LH: loop header
LB: loop body
LE: loop exit
PB: predicated region body
PF: predicated region fallthrough
CT: control target
= control target key end

     0   :  { %17 = vsyncpa [#allocation3], 0  ;;  %s3680_s0 = inlined_call_operand.hbm [shape: f32[8,2,8], index: 0, kind: input, shape index: {}]   ;;  %s3681_s1 = inlined_call_operand.hbm [shape: f32[8,128], index: 1, kind: input, shape index: {}]   ;;  %s3682_s2 = inlined_call_operand.vmem [shape: f32[32,128], index: 2, kind: input, shape index: {}]   ;;  %s3683_s3 = inlined_call_operand.vmem [shape: f32[1,128], index: 3, kind: input, shape index: {}]   ;;  %s3684_s4 = inlined_call_operand.hbm [shape: f32[64,128], index: 4, kind: input, shape index: {}]   ;;  %s3685_s5 = inlined_call_operand.vmem [shape: f32[1,128], index: 5, kind: input, shape index: {}]   ;;  %s3686_s6 = inlined_call_operand.vmem [shape: f32[32,16], index: 6, kind: input, shape index: {}]   ;;  %s3687_s7 = inlined_call_operand.vmem [shape: f32[1,16], index: 7, kind: input, shape index: {}]   ;;  %s3688_s8 = inlined_call_operand.hbm [shape: f32[16,40], index: 8, kind: input, shape index: {}]   ;;  %s3689_s9 = inlined_call_operand.vmem [shape: f32[1,40], index: 9, kind: input, shape index: {}]   ;;  %s3690_s10 = inlined_call_operand.vmem [shape: f32[40,128], index: 10, kind: input, shape index: {}]   ;;  %s3691_s11 = inlined_call_operand.vmem [shape: f32[1,128], index: 11, kind: input, shape index: {}]   ;;  %s3692_s12 = inlined_call_operand.hbm [shape: f32[2,128], index: 12, kind: output, shape index: {}]  }
   0x1   :  { %18 = vsyncpa [#allocation6], 0 }
   0x2   :  { %19 = vsyncpa [#allocation9], 0 }
   0x3   :  { %20 = vsyncpa [#allocation4], 0  ;;  %s3135_s21 = smov [#allocation5]   ;;  %s3136_s23 = smov [#allocation2]  }
   0x4   :  { %s39_s22 = sshll.u32 %s3135_s21, 4  ;;  %s26_s24 = sshll.u32 %s3136_s23, 4  ;;  %s40_s22 = int_to_ptr.vmem [resolvable:$true] %s39_s22  ;;  %s3214_s24 = int_to_ptr.vmem [resolvable:$true] %s26_s24 }
   0x5   :  { %s3017_s27 = scalar_lea.hbm %s3681_s1, 128 }
   0x6   :  { %p3018_p0 = scmp.ne.s32.totalorder %s3681_s1, %s3017_s27  ;;  %p3021_p1 = scmp.lt.u32.totalorder %s3017_s27, %s3681_s1 }
   0x8   :  { %p3023_p2 = pnand %p3021_p1, %p3018_p0 }
   0xa   :  { %3026 = shalt.err (!%p3023_p2)
}
   0xb   :  { %s3027_s14 = scalar_lea.vmem %s40_s22, 128  ;;  %p3032_p4 = scmp.lt.s32.totalorder %s40_s22, %s40_s22 }
   0xc   :  { %p3028_p3 = scmp.ne.s32.totalorder %s40_s22, %s3027_s14  ;;  %p3033_p5 = scmp.lt.s32.totalorder %s3027_s14, %s3027_s14 }
   0xe   :  { %p3034_p6 = por %p3033_p5, %p3032_p4 }
  0x10   :  { %p3035_p7 = pnand %p3034_p6, %p3028_p3 }
  0x12   :  { %3038 = shalt.err (!%p3035_p7)
}
  0x13   :  { %42 = dma.hbm_to_vmem [thread:$0]  %s3681_s1, 128, %s40_s22, [#allocation6]  }
  0x14   :  { %s3039_s19 = scalar_lea.hbm %s3680_s0, 256 }
  0x15   :  { %p3040_p8 = scmp.ne.s32.totalorder %s3680_s0, %s3039_s19  ;;  %p3043_p9 = scmp.lt.u32.totalorder %s3039_s19, %s3680_s0 }
  0x17   :  { %p3045_p10 = pnand %p3043_p9, %p3040_p8 }
  0x19   :  { %3048 = shalt.err (!%p3045_p10)
}
  0x1a   :  { %s3049_s26 = scalar_lea.vmem %s3214_s24, 256  ;;  %p3054_p12 = scmp.lt.s32.totalorder %s3214_s24, %s3214_s24 }
  0x1b   :  { %p3050_p11 = scmp.ne.s32.totalorder %s3214_s24, %s3049_s26  ;;  %p3055_p13 = scmp.lt.s32.totalorder %s3049_s26, %s3049_s26 }
  0x1d   :  { %p3056_p0 = por %p3055_p13, %p3054_p12 }
  0x1f   :  { %p3057_p1 = pnand %p3056_p0, %p3050_p11 }
  0x21   :  { %3060 = shalt.err (!%p3057_p1)
}
  0x22   :  { %s3137_s1 = smov 32   ;;  %s3138_s22 = smov 2  }
  0x23   :  { %32 = dma.hbm_to_vmem [thread:$0]  %s3680_s0, 256, %s3214_s24, [#allocation3], %s3137_s1, %s3137_s1, %s3138_s22  }
  0x24   :  { %s3139_s29 = smov [#allocation7]   ;;  %s3061_s15 = scalar_lea.hbm %s3684_s4, 1024 }
  0x25   :  { %s52_s30 = sshll.u32 %s3139_s29, 4  ;;  %p3062_p2 = scmp.ne.s32.totalorder %s3684_s4, %s3061_s15  ;;  %s53_s30 = int_to_ptr.vmem [resolvable:$true] %s52_s30 }
  0x26   :  { %p3065_p3 = scmp.lt.u32.totalorder %s3061_s15, %s3684_s4 }
  0x28   :  { %p3067_p4 = pnand %p3065_p3, %p3062_p2 }
  0x2a   :  { %3070 = shalt.err (!%p3067_p4)
}
  0x2b   :  { %s3071_s20 = scalar_lea.vmem %s53_s30, 1024  ;;  %p3076_p6 = scmp.lt.s32.totalorder %s53_s30, %s53_s30 }
  0x2c   :  { %p3072_p5 = scmp.ne.s32.totalorder %s53_s30, %s3071_s20  ;;  %p3077_p7 = scmp.lt.s32.totalorder %s3071_s20, %s3071_s20 }
  0x2e   :  { %p3078_p8 = por %p3077_p7, %p3076_p6 }
  0x30   :  { %p3079_p9 = pnand %p3078_p8, %p3072_p5 }
  0x32   :  { %3082 = shalt.err (!%p3079_p9)
}
  0x33   :  { %s3140_s0 = smov 128   ;;  %s3141_s24 = smov 8  }
  0x34   :  { %58 = dma.hbm_to_vmem [thread:$0]  %s3684_s4, 1024, %s53_s30, [#allocation6], %s3140_s0, %s3140_s0, %s3141_s24  }
  0x35   :  { %s3142_s25 = smov [#allocation8]   ;;  %s3083_s28 = scalar_lea.hbm %s3688_s8, 256 }
  0x36   :  { %s70_s26 = sshll.u32 %s3142_s25, 4  ;;  %p3084_p10 = scmp.ne.s32.totalorder %s3688_s8, %s3083_s28  ;;  %s71_s26 = int_to_ptr.vmem [resolvable:$true] %s70_s26 }
  0x37   :  { %p3087_p11 = scmp.lt.u32.totalorder %s3083_s28, %s3688_s8 }
  0x39   :  { %p3089_p12 = pnand %p3087_p11, %p3084_p10 }
  0x3b   :  { %3092 = shalt.err (!%p3089_p12)
}
  0x3c   :  { %s3093_s16 = scalar_lea.vmem %s71_s26, 256  ;;  %p3098_p0 = scmp.lt.s32.totalorder %s71_s26, %s71_s26 }
  0x3d   :  { %p3094_p13 = scmp.ne.s32.totalorder %s71_s26, %s3093_s16  ;;  %p3099_p1 = scmp.lt.s32.totalorder %s3093_s16, %s3093_s16 }
  0x3f   :  { %p3100_p2 = por %p3099_p1, %p3098_p0 }
  0x41   :  { %p3101_p3 = pnand %p3100_p2, %p3094_p13 }
  0x43   :  { %3104 = shalt.err (!%p3101_p3)
}
  0x44   :  { %76 = dma.hbm_to_vmem [thread:$0]  %s3688_s8, 256, %s71_s26, [#allocation9], %s3140_s0, %s3140_s0, %s3141_s24  }
  0x45   :  { %3127 = dma.done.wait [#allocation3], 256  }
  0x46   :  { %3128 = vsyncadd [#allocation3], 4294967040 }
  0x47   :  { %3129 = dma.done.wait [#allocation6], 1152  }
  0x48   :  { %3130 = vsyncadd [#allocation6], 4294966144 }
  0x49   :  { %3131 = dma.done.wait [#allocation9], 256  }
  0x4a   :  { %3132 = vsyncadd [#allocation9], 4294967040  ;;  %v124_v0 = vlaneseq  ;;  %v3143_v1 = vmov 0.0|0.0   ;;  %v3144_v2 = vmov 1983009808   ;;  %vm3145_vm0 = vmmov 0  }
  0x4b   :  { %2708 = vmatprep.subr.bf16.mxu1 %v3143_v1  ;;  %v122_v3 = vunpack.c.l.s4 %v3144_v2  ;;  %v3146_v4 = vmov 0.0   ;;  %v277_v7 = vld [vmem:[%s3682_s2] sm:$0xff]  ;;  %v278_v8 = vld [vmem:[%s3682_s2 + $0x8] sm:$0xff]  ;;  %v103_v9 = vld [vmem:[#allocation5] sm:$0xff]  ;;  %vm153_vm1 = vcmask 64512   ;;  %s3147_s25 = smov 64  }
  0x4c   :  { %2445 = vmatprep.mubr.msk.f32.mxu1 %vm3145_vm0, %v3146_v4  ;;  %v125_v6 = vshrl.u32 %v124_v0, 7  ;;  %v3282_v11 = vpack.c.bf16 %v278_v8, %v277_v7  ;;  %2432 = vmatprep.subr.mxu0 %v103_v9  ;;  %v95_v12 = vld [vmem:[#allocation2] sm:$0x3]  ;;  %v96_v13 = vld [vmem:[#allocation2 + $0x2] sm:$0x3]  ;;  %v279_v23 = vld [vmem:[%s3682_s2 + $0x10] sm:$0xff] }
  0x4d   :  { %v123_v5 = vunpack.c.0.s8 %v122_v3  ;;  %v97_v14 = vld [vmem:[#allocation2 + $0x4] sm:$0x3]  ;;  %2433 = vmatpush3.msra.mxu0 %v103_v9  ;;  %v98_v15 = vld [vmem:[#allocation2 + $0x6] sm:$0x3]  ;;  %v119_v16 = vcombine.low %v95_v12, %v96_v13  ;;  %v99_v17 = vld [vmem:[#allocation2 + $0x8] sm:$0x3] }
  0x4e   :  { %v100_v18 = vld [vmem:[#allocation2 + $0xa] sm:$0x3]  ;;  %2710 = vmatpush3.bf16.msra.mxu1 %v3282_v11  ;;  %v120_v19 = vcombine.low %v97_v14, %v98_v15  ;;  %v101_v20 = vld [vmem:[#allocation2 + $0xc] sm:$0x3]  ;;  %v102_v21 = vld [vmem:[#allocation2 + $0xe] sm:$0x3]  ;;  %2714 = vmatprep.subr.bf16.mxu0 %v3143_v1 }
  0x4f   :  { %v3280_v10 = vsub.s32 %v123_v5, %v125_v6  ;;  %v136_v22 = vcombine.low %v99_v17, %v100_v18  ;;  %v137_v25 = vcombine.low %v101_v20, %v102_v21  ;;  %2711 = vmatprep.subr.bf16.mxu1 %v3143_v1  ;;  %v280_v26 = vld [vmem:[%s3682_s2 + $0x18] sm:$0xff]  ;;  %v2260_v33 = vld [vmem:[%s3683_s3] ss:$0 sm:$0xff]  ;;  %v283_v54 = vld [vmem:[#allocation7 + $0x10] sm:$0xff]  ;;  %vm296_vm2 = vcmask 261120  }
  0x50   :  { %v3296_v29 = vpack.c.bf16 %v280_v26, %v279_v23  ;;  %v281_v52 = vld [vmem:[#allocation7] sm:$0xff]  ;;  %v282_v53 = vld [vmem:[#allocation7 + $0x8] sm:$0xff]  ;;  %v284_v56 = vld [vmem:[#allocation7 + $0x18] sm:$0xff]  ;;  %vm407_vm3 = vcmask 523264   ;;  %vm2076_vm4 = vcmask 130048   ;;  %vm2168_vm5 = vcmask 326656  }
  0x51   :  { %v127_v24 = vrot.slane %v119_v16, %v3280_v10  ;;  %v134_v27 = vrot.slane %v120_v19, %v3280_v10  ;;  %v144_v28 = vrot.slane %v136_v22, %v3280_v10  ;;  %v151_v30 = vrot.slane %v137_v25, %v3280_v10  ;;  %v285_v58 = vld [vmem:[#allocation7 + $0x20] sm:$0xff]  ;;  %v286_v59 = vld [vmem:[#allocation7 + $0x28] sm:$0xff]  ;;  %v287_v62 = vld [vmem:[#allocation7 + $0x30] sm:$0xff] }
  0x52   :  { %2713 = vmatpush3.bf16.msra.mxu1 %v3296_v29  ;;  %v3327_v55 = vpack.c.bf16 %v282_v53, %v281_v52  ;;  %v3330_v57 = vpack.c.bf16 %v284_v56, %v283_v54  ;;  %v3334_v60 = vpack.c.bf16 %v286_v59, %v285_v58  ;;  %v288_v63 = vld [vmem:[#allocation7 + $0x38] sm:$0xff]  ;;  %v3370_v9 = vld [vmem:[%s3685_s5] ss:$0 sm:$0xff] }
  0x53   :  { %v135_v31 = vcombine.low %v127_v24, %v134_v27  ;;  %v152_v32 = vcombine.low %v144_v28, %v151_v30  ;;  %2726 = vmatprep.subr.bf16.mxu1 %v3143_v1  ;;  %v3339_v0 = vpack.c.bf16 %v288_v63, %v287_v62 }
  0x55   :  { %2434 = vmatprep.mubr.msk.f32.mxu0 %vm153_vm1, %v135_v31  ;;  %2446 = vmatmul.mubr.f32.vlgmr.msra.gmra.mrb[0].mxu1 %v3146_v4 }
  0x56   :  { %2435 = vmatmul.mubr.msk.f32.vlgmr.msra.gmra.mrb[0].mxu0 %vm153_vm1, %v152_v32  ;;  %2728 = vmatpush3.bf16.msra.mxu1 %v3282_v11 }
  0x57   :  { %2475 = vmatprep.mubr.msk.f32.mxu1 %vm3145_vm0, %v3146_v4  ;;  %2729 = vmatprep.subr.bf16.mxu1 %v3143_v1 }
  0x58   :  { %2464 = vmatprep.mubr.msk.f32.mxu0 %vm3145_vm0, %v3146_v4  ;;  %2716 = vmatpush3.bf16.msra.mxu0 %v3327_v55 }
  0x59   :  { %2717 = vmatprep.subr.bf16.mxu0 %v3143_v1 }
  0x5a   :  { %2731 = vmatpush3.bf16.msra.mxu1 %v3296_v29 }
  0x5b   :  { %2732 = vmatprep.subr.bf16.mxu1 %v3143_v1 }
  0x5c   :  { %2719 = vmatpush3.bf16.msra.mxu0 %v3330_v57 }
  0x5d   :  { %2720 = vmatprep.subr.bf16.mxu0 %v3143_v1 }
  0x60   :  { %2722 = vmatpush3.bf16.msra.mxu0 %v3334_v60 }
  0x61   :  { %2723 = vmatprep.subr.bf16.mxu0 %v3143_v1 }
  0x64   :  { %2725 = vmatpush3.bf16.msra.mxu0 %v3339_v0 }
  0x65   :  { %2744 = vmatprep.subr.bf16.mxu0 %v3143_v1 }
 0x128   :  { %v366_v35 = vpop.f32.mrb[0].mxu1 }
 0x129   :  { %v2436_v34 = vpop.f32.mrb[0].mxu0  ;;  %v2447_v38 = vpop.f32.mrb[1].mxu1 }
 0x12a   :  { %v3313_v36 = vadd.f32 %v2436_v34, %v2260_v33  ;;  %v224_v37 = vpop.f32.mrb[1].mxu0 }
 0x12b   :  { %v3315_v39 = vadd.f32 %v2260_v33, %v224_v37 }
 0x12d   :  { %v3319_v40 = vrot.slane %v3315_v39, %v3280_v10 }
 0x12f   :  { %v370_v41 = vadd.f32 %v366_v35, %v3319_v40  ;;  %v250_v8 = vcombine.high %v3319_v40, %v3319_v40 }
 0x131   :  { %2881 = vtanh.f32 %v370_v41  ;;  %v2264_v43 = vmul.f32 -1.442695, %v370_v41 }
 0x133   :  { %2883 = vpow2.f32 %v2264_v43 }
 0x13b   :  { %v2882_v42 = vpop.eup %2881 }
 0x13c   :  { %380 = vrot.lane.b32.xlu0 %v2882_v42, %s3147_s25 }
 0x13d   :  { %v2884_v44 = vpop.eup %2883 }
 0x13e   :  { %v374_v45 = vadd.f32 1.0, %v2884_v44 }
 0x140   :  { %2885 = vrcp.f32 %v374_v45 }
 0x14a   :  { %v2886_v46 = vpop.eup %2885 }
 0x14b   :  { %v378_v49 = vmul.f32 0.0, %v2886_v46 }
 0x1ae   :  { %v381_v47 = vpop.permute.xlu0 %380 }
 0x1af   :  { %v383_v48 = vmul.f32 %v2886_v46, %v381_v47 }
 0x1b1   :  { %385 = vrot.lane.b32.xlu0 %v383_v48, %s3137_s1 }
 0x223   :  { %v386_v50 = vpop.permute.xlu0 %385 }
 0x224   :  { %v3324_v51 = vadd.f32 %v386_v50, %v378_v49 }
 0x226   :  { %2887 = vtanh.f32 %v3324_v51 }
 0x230   :  { %v2888_v61 = vpop.eup %2887 }
 0x231   :  { %391 = vrot.lane.b32.xlu1 %v2888_v61, %s3147_s25 }
 0x2a3   :  { %v392_v2 = vpop.permute.xlu1 %391 }
 0x2a4   :  { %v394_v3 = vmul.f32 %v2886_v46, %v392_v2 }
 0x2a6   :  { %v402_v5 = vrot.slane %v394_v3, %v3280_v10 }
 0x2a8   :  { %403 = vrot.lane.b32.xlu1 %v402_v5, %s3137_s1 }
 0x31a   :  { %v404_v6 = vpop.permute.xlu1 %403 }
 0x31b   :  { %v406_v7 = vsel %vm296_vm2, %v404_v6, 0.0  ;;  %2476 = vmatmul.mubr.msk.f32.vlgmr.msra.gmra.mrb[2].mxu1 %vm296_vm2, %v404_v6 }
 0x31c   :  { %2465 = vmatmul.mubr.msk.f32.vlgmr.msra.gmra.mrb[2].mxu0 %vm407_vm3, %v406_v7  ;;  %2734 = vmatpush3.bf16.msra.mxu1 %v3327_v55 }
 0x31d   :  { %2735 = vmatprep.subr.bf16.mxu1 %v3143_v1  ;;  %2746 = vmatpush3.bf16.msra.mxu0 %v3282_v11 }
 0x31e   :  { %2747 = vmatprep.subr.bf16.mxu0 %v3143_v1  ;;  %2505 = vmatprep.mubr.msk.f32.mxu0 %vm3145_vm0, %v3146_v4 }
 0x31f   :  { %2494 = vmatprep.mubr.msk.f32.mxu1 %vm3145_vm0, %v3146_v4 }
 0x320   :  { %2737 = vmatpush3.bf16.msra.mxu1 %v3330_v57 }
 0x321   :  { %2738 = vmatprep.subr.bf16.mxu1 %v3143_v1  ;;  %2749 = vmatpush3.bf16.msra.mxu0 %v3296_v29 }
 0x322   :  { %2750 = vmatprep.subr.bf16.mxu0 %v3143_v1 }
 0x324   :  { %2740 = vmatpush3.bf16.msra.mxu1 %v3334_v60 }
 0x325   :  { %2741 = vmatprep.subr.bf16.mxu1 %v3143_v1 }
 0x328   :  { %2743 = vmatpush3.bf16.msra.mxu1 %v3339_v0 }
 0x329   :  { %2762 = vmatprep.subr.bf16.mxu1 %v3143_v1 }
 0x3ee   :  { %v573_v12 = vpop.f32.mrb[2].mxu1 }
 0x3ef   :  { %v577_v13 = vadd.f32 %v573_v12, %v250_v8  ;;  %v477_v14 = vpop.f32.mrb[2].mxu0  ;;  %v2477_v15 = vpop.f32.mrb[3].mxu1 }
 0x3f0   :  { %v478_v16 = vadd.f32 %v3370_v9, %v477_v14  ;;  %v2466_v17 = vpop.f32.mrb[3].mxu0 }
 0x3f1   :  { %2889 = vtanh.f32 %v577_v13  ;;  %v2268_v20 = vmul.f32 -1.442695, %v577_v13 }
 0x3f2   :  { %2891 = vtanh.f32 %v478_v16  ;;  %v2266_v21 = vmul.f32 -1.442695, %v478_v16 }
 0x3f3   :  { %2893 = vpow2.f32 %v2268_v20 }
 0x3f4   :  { %2895 = vpow2.f32 %v2266_v21 }
 0x3fb   :  { %v2890_v18 = vpop.eup %2889 }
 0x3fc   :  { %v2892_v19 = vpop.eup %2891  ;;  %587 = vrot.lane.b32.xlu0 %v2890_v18, %s3147_s25 }
 0x3fd   :  { %490 = vrot.lane.b32.xlu1 %v2892_v19, %s3147_s25  ;;  %v2894_v22 = vpop.eup %2893 }
 0x3fe   :  { %v2896_v23 = vpop.eup %2895  ;;  %v581_v24 = vadd.f32 1.0, %v2894_v22 }
 0x3ff   :  { %v484_v25 = vadd.f32 1.0, %v2896_v23 }
 0x400   :  { %2897 = vrcp.f32 %v581_v24 }
 0x401   :  { %2899 = vrcp.f32 %v484_v25 }
 0x40a   :  { %v2898_v26 = vpop.eup %2897 }
 0x40b   :  { %v2900_v28 = vpop.eup %2899  ;;  %v585_v33 = vmul.f32 %v2898_v26, %v3324_v51  ;;  %v235_v51 = vcombine.high %v3315_v39, %v3315_v39 }
 0x40c   :  { %v488_v35 = vmul.f32 0.0, %v2900_v28 }
 0x40d   :  { %v3411_v52 = vrot.slane %v235_v51, %v3280_v10 }
 0x46e   :  { %v588_v27 = vpop.permute.xlu0 %587 }
 0x46f   :  { %v590_v30 = vmul.f32 %v2898_v26, %v588_v27  ;;  %v491_v31 = vpop.permute.xlu1 %490 }
 0x470   :  { %v493_v32 = vmul.f32 %v2900_v28, %v491_v31 }
 0x471   :  { %592 = vrot.lane.b32.xlu0 %v590_v30, %s3137_s1 }
 0x472   :  { %495 = vrot.lane.b32.xlu1 %v493_v32, %s3137_s1 }
 0x4e3   :  { %v593_v34 = vpop.permute.xlu0 %592 }
 0x4e4   :  { %v3378_v37 = vadd.f32 %v593_v34, %v585_v33  ;;  %v496_v38 = vpop.permute.xlu1 %495  ;;  %v251_v34 = vcombine.high %v3411_v52, %v3411_v52 }
 0x4e5   :  { %v3380_v40 = vadd.f32 %v496_v38, %v488_v35 }
 0x4e6   :  { %2901 = vtanh.f32 %v3378_v37 }
 0x4e7   :  { %2903 = vtanh.f32 %v3380_v40 }
 0x4f0   :  { %v2902_v41 = vpop.eup %2901 }
 0x4f1   :  { %v2904_v42 = vpop.eup %2903  ;;  %598 = vrot.lane.b32.xlu0 %v2902_v41, %s3147_s25 }
 0x4f2   :  { %501 = vrot.lane.b32.xlu1 %v2904_v42, %s3147_s25 }
 0x563   :  { %v599_v43 = vpop.permute.xlu0 %598 }
 0x564   :  { %v601_v44 = vmul.f32 %v2898_v26, %v599_v43  ;;  %v502_v45 = vpop.permute.xlu1 %501 }
 0x565   :  { %v504_v46 = vmul.f32 %v2900_v28, %v502_v45 }
 0x566   :  { %v609_v47 = vrot.slane %v601_v44, %v3280_v10 }
 0x567   :  { %614 = vrot.lane.b32.xlu1 %v504_v46, %s3147_s25 }
 0x568   :  { %610 = vrot.lane.b32.xlu0 %v609_v47, %s3137_s1 }
 0x5d9   :  { %v615_v48 = vpop.permute.xlu1 %614 }
 0x5da   :  { %v611_v49 = vpop.permute.xlu0 %610 }
 0x5db   :  { %v617_v50 = vsel %vm296_vm2, %v611_v49, %v615_v48  ;;  %2506 = vmatmul.mubr.msk.f32.vlgmr.msra.gmra.mrb[4].mxu0 %vm296_vm2, %v611_v49 }
 0x5dc   :  { %2495 = vmatmul.mubr.msk.f32.vlgmr.msra.gmra.mrb[4].mxu1 %vm407_vm3, %v617_v50  ;;  %2752 = vmatpush3.bf16.msra.mxu0 %v3327_v55 }
 0x5dd   :  { %2753 = vmatprep.subr.bf16.mxu0 %v3143_v1  ;;  %2764 = vmatpush3.bf16.msra.mxu1 %v3282_v11 }
 0x5de   :  { %2765 = vmatprep.subr.bf16.mxu1 %v3143_v1  ;;  %2535 = vmatprep.mubr.msk.f32.mxu1 %vm3145_vm0, %v3146_v4 }
 0x5df   :  { %2524 = vmatprep.mubr.msk.f32.mxu0 %vm3145_vm0, %v3146_v4 }
 0x5e0   :  { %2755 = vmatpush3.bf16.msra.mxu0 %v3330_v57 }
 0x5e1   :  { %2756 = vmatprep.subr.bf16.mxu0 %v3143_v1  ;;  %2767 = vmatpush3.bf16.msra.mxu1 %v3296_v29 }
 0x5e2   :  { %2768 = vmatprep.subr.bf16.mxu1 %v3143_v1 }
 0x5e4   :  { %2758 = vmatpush3.bf16.msra.mxu0 %v3334_v60 }
 0x5e5   :  { %2759 = vmatprep.subr.bf16.mxu0 %v3143_v1 }
 0x5e8   :  { %2761 = vmatpush3.bf16.msra.mxu0 %v3339_v0 }
 0x5e9   :  { %2780 = vmatprep.subr.bf16.mxu0 %v3143_v1 }
 0x6ae   :  { %v783_v53 = vpop.f32.mrb[4].mxu0 }
 0x6af   :  { %v787_v54 = vadd.f32 %v783_v53, %v3411_v52  ;;  %v687_v56 = vpop.f32.mrb[4].mxu1  ;;  %v2507_v58 = vpop.f32.mrb[5].mxu0 }
 0x6b0   :  { %v688_v59 = vadd.f32 %v3370_v9, %v687_v56  ;;  %v2496_v61 = vpop.f32.mrb[5].mxu1 }
 0x6b1   :  { %2905 = vtanh.f32 %v787_v54  ;;  %v2272_v39 = vmul.f32 -1.442695, %v787_v54 }
 0x6b2   :  { %2907 = vtanh.f32 %v688_v59  ;;  %v2270_v2 = vmul.f32 -1.442695, %v688_v59 }
 0x6b3   :  { %2909 = vpow2.f32 %v2272_v39 }
 0x6b4   :  { %2911 = vpow2.f32 %v2270_v2 }
 0x6bb   :  { %v2906_v62 = vpop.eup %2905 }
 0x6bc   :  { %v2908_v63 = vpop.eup %2907  ;;  %797 = vrot.lane.b32.xlu0 %v2906_v62, %s3147_s25 }
 0x6bd   :  { %700 = vrot.lane.b32.xlu1 %v2908_v63, %s3147_s25  ;;  %v2910_v3 = vpop.eup %2909 }
 0x6be   :  { %v2912_v5 = vpop.eup %2911  ;;  %v791_v6 = vadd.f32 1.0, %v2910_v3 }
 0x6bf   :  { %v694_v7 = vadd.f32 1.0, %v2912_v5 }
 0x6c0   :  { %2913 = vrcp.f32 %v791_v6 }
 0x6c1   :  { %2915 = vrcp.f32 %v694_v7 }
 0x6ca   :  { %v2914_v8 = vpop.eup %2913 }
 0x6cb   :  { %v2916_v13 = vpop.eup %2915  ;;  %v795_v17 = vmul.f32 %v2914_v8, %v3378_v37 }
 0x6cc   :  { %v698_v19 = vmul.f32 %v2916_v13, %v3380_v40 }
 0x72e   :  { %v798_v12 = vpop.permute.xlu0 %797 }
 0x72f   :  { %v800_v14 = vmul.f32 %v2914_v8, %v798_v12  ;;  %v701_v15 = vpop.permute.xlu1 %700 }
 0x730   :  { %v703_v16 = vmul.f32 %v2916_v13, %v701_v15 }
 0x731   :  { %802 = vrot.lane.b32.xlu0 %v800_v14, %s3137_s1 }
 0x732   :  { %705 = vrot.lane.b32.xlu1 %v703_v16, %s3137_s1 }
 0x7a3   :  { %v803_v18 = vpop.permute.xlu0 %802 }
 0x7a4   :  { %v3421_v20 = vadd.f32 %v803_v18, %v795_v17  ;;  %v706_v21 = vpop.permute.xlu1 %705  ;;  %v3492_v17 = vrot.slane %v3313_v36, %v3280_v10 }
 0x7a5   :  { %v3423_v22 = vadd.f32 %v706_v21, %v698_v19 }
 0x7a6   :  { %2917 = vtanh.f32 %v3421_v20 }
 0x7a7   :  { %2919 = vtanh.f32 %v3423_v22 }
 0x7b0   :  { %v2918_v23 = vpop.eup %2917 }
 0x7b1   :  { %v2920_v24 = vpop.eup %2919  ;;  %808 = vrot.lane.b32.xlu0 %v2918_v23, %s3147_s25 }
 0x7b2   :  { %711 = vrot.lane.b32.xlu1 %v2920_v24, %s3147_s25 }
 0x823   :  { %v809_v25 = vpop.permute.xlu0 %808 }
 0x824   :  { %v811_v26 = vmul.f32 %v2914_v8, %v809_v25  ;;  %v712_v27 = vpop.permute.xlu1 %711 }
 0x825   :  { %v714_v28 = vmul.f32 %v2916_v13, %v712_v27 }
 0x826   :  { %v819_v30 = vrot.slane %v811_v26, %v3280_v10 }
 0x827   :  { %824 = vrot.lane.b32.xlu1 %v714_v28, %s3147_s25 }
 0x828   :  { %820 = vrot.lane.b32.xlu0 %v819_v30, %s3137_s1 }
 0x899   :  { %v825_v31 = vpop.permute.xlu1 %824 }
 0x89a   :  { %v821_v32 = vpop.permute.xlu0 %820 }
 0x89b   :  { %v827_v33 = vsel %vm296_vm2, %v821_v32, %v825_v31  ;;  %2536 = vmatmul.mubr.msk.f32.vlgmr.msra.gmra.mrb[6].mxu1 %vm296_vm2, %v821_v32 }
 0x89c   :  { %2525 = vmatmul.mubr.msk.f32.vlgmr.msra.gmra.mrb[6].mxu0 %vm407_vm3, %v827_v33  ;;  %2770 = vmatpush3.bf16.msra.mxu1 %v3327_v55 }
 0x89d   :  { %2771 = vmatprep.subr.bf16.mxu1 %v3143_v1  ;;  %2782 = vmatpush3.bf16.msra.mxu0 %v3282_v11 }
 0x89e   :  { %2783 = vmatprep.subr.bf16.mxu0 %v3143_v1  ;;  %2565 = vmatprep.mubr.msk.f32.mxu0 %vm3145_vm0, %v3146_v4 }
 0x89f   :  { %2554 = vmatprep.mubr.msk.f32.mxu1 %vm3145_vm0, %v3146_v4 }
 0x8a0   :  { %2773 = vmatpush3.bf16.msra.mxu1 %v3330_v57 }
 0x8a1   :  { %2774 = vmatprep.subr.bf16.mxu1 %v3143_v1  ;;  %2785 = vmatpush3.bf16.msra.mxu0 %v3296_v29 }
 0x8a2   :  { %2786 = vmatprep.subr.bf16.mxu0 %v3143_v1 }
 0x8a4   :  { %2776 = vmatpush3.bf16.msra.mxu1 %v3334_v60 }
 0x8a5   :  { %2777 = vmatprep.subr.bf16.mxu1 %v3143_v1 }
 0x8a8   :  { %2779 = vmatpush3.bf16.msra.mxu1 %v3339_v0 }
 0x8a9   :  { %2798 = vmatprep.subr.bf16.mxu1 %v3143_v1 }
 0x96e   :  { %v993_v35 = vpop.f32.mrb[6].mxu1 }
 0x96f   :  { %v997_v37 = vadd.f32 %v993_v35, %v251_v34  ;;  %v897_v38 = vpop.f32.mrb[6].mxu0  ;;  %v2537_v40 = vpop.f32.mrb[7].mxu1 }
 0x970   :  { %v898_v41 = vadd.f32 %v3370_v9, %v897_v38  ;;  %v2526_v42 = vpop.f32.mrb[7].mxu0 }
 0x971   :  { %2921 = vtanh.f32 %v997_v37  ;;  %v2276_v45 = vmul.f32 -1.442695, %v997_v37 }
 0x972   :  { %2923 = vtanh.f32 %v898_v41  ;;  %v2274_v46 = vmul.f32 -1.442695, %v898_v41 }
 0x973   :  { %2925 = vpow2.f32 %v2276_v45 }
 0x974   :  { %2927 = vpow2.f32 %v2274_v46 }
 0x97b   :  { %v2922_v43 = vpop.eup %2921 }
 0x97c   :  { %v2924_v44 = vpop.eup %2923  ;;  %1007 = vrot.lane.b32.xlu0 %v2922_v43, %s3147_s25 }
 0x97d   :  { %910 = vrot.lane.b32.xlu1 %v2924_v44, %s3147_s25  ;;  %v2926_v47 = vpop.eup %2925 }
 0x97e   :  { %v2928_v48 = vpop.eup %2927  ;;  %v1001_v49 = vadd.f32 1.0, %v2926_v47 }
 0x97f   :  { %v904_v50 = vadd.f32 1.0, %v2928_v48 }
 0x980   :  { %2929 = vrcp.f32 %v1001_v49 }
 0x981   :  { %2931 = vrcp.f32 %v904_v50 }
 0x98a   :  { %v2930_v51 = vpop.eup %2929 }
 0x98b   :  { %v2932_v53 = vpop.eup %2931  ;;  %v1005_v59 = vmul.f32 %v2930_v51, %v3421_v20 }
 0x98c   :  { %v908_v62 = vmul.f32 %v2932_v53, %v3423_v22 }
 0x9ee   :  { %v1008_v52 = vpop.permute.xlu0 %1007 }
 0x9ef   :  { %v1010_v54 = vmul.f32 %v2930_v51, %v1008_v52  ;;  %v911_v56 = vpop.permute.xlu1 %910 }
 0x9f0   :  { %v913_v58 = vmul.f32 %v2932_v53, %v911_v56 }
 0x9f1   :  { %1012 = vrot.lane.b32.xlu0 %v1010_v54, %s3137_s1 }
 0x9f2   :  { %915 = vrot.lane.b32.xlu1 %v913_v58, %s3137_s1 }
 0xa63   :  { %v1013_v61 = vpop.permute.xlu0 %1012 }
 0xa64   :  { %v3460_v63 = vadd.f32 %v1013_v61, %v1005_v59  ;;  %v916_v39 = vpop.permute.xlu1 %915  ;;  %v267_v59 = vcombine.high %v3492_v17, %v3492_v17 }
 0xa65   :  { %v3462_v2 = vadd.f32 %v916_v39, %v908_v62 }
 0xa66   :  { %2933 = vtanh.f32 %v3460_v63 }
 0xa67   :  { %2935 = vtanh.f32 %v3462_v2 }
 0xa70   :  { %v2934_v3 = vpop.eup %2933 }
 0xa71   :  { %v2936_v5 = vpop.eup %2935  ;;  %1018 = vrot.lane.b32.xlu0 %v2934_v3, %s3147_s25 }
 0xa72   :  { %921 = vrot.lane.b32.xlu1 %v2936_v5, %s3147_s25 }
 0xae3   :  { %v1019_v6 = vpop.permute.xlu0 %1018 }
 0xae4   :  { %v1021_v7 = vmul.f32 %v2930_v51, %v1019_v6  ;;  %v922_v8 = vpop.permute.xlu1 %921 }
 0xae5   :  { %v924_v12 = vmul.f32 %v2932_v53, %v922_v8 }
 0xae6   :  { %v1029_v13 = vrot.slane %v1021_v7, %v3280_v10 }
 0xae7   :  { %1034 = vrot.lane.b32.xlu1 %v924_v12, %s3147_s25 }
 0xae8   :  { %1030 = vrot.lane.b32.xlu0 %v1029_v13, %s3137_s1 }
 0xb59   :  { %v1035_v14 = vpop.permute.xlu1 %1034 }
 0xb5a   :  { %v1031_v15 = vpop.permute.xlu0 %1030 }
 0xb5b   :  { %v1037_v16 = vsel %vm296_vm2, %v1031_v15, %v1035_v14  ;;  %2566 = vmatmul.mubr.msk.f32.vlgmr.msra.gmra.mrb[8].mxu0 %vm296_vm2, %v1031_v15 }
 0xb5c   :  { %2555 = vmatmul.mubr.msk.f32.vlgmr.msra.gmra.mrb[8].mxu1 %vm407_vm3, %v1037_v16  ;;  %2788 = vmatpush3.bf16.msra.mxu0 %v3327_v55 }
 0xb5d   :  { %2789 = vmatprep.subr.bf16.mxu0 %v3143_v1  ;;  %2800 = vmatpush3.bf16.msra.mxu1 %v3282_v11 }
 0xb5e   :  { %2801 = vmatprep.subr.bf16.mxu1 %v3143_v1  ;;  %2595 = vmatprep.mubr.msk.f32.mxu1 %vm3145_vm0, %v3146_v4 }
 0xb5f   :  { %2584 = vmatprep.mubr.msk.f32.mxu0 %vm3145_vm0, %v3146_v4 }
 0xb60   :  { %2791 = vmatpush3.bf16.msra.mxu0 %v3330_v57 }
 0xb61   :  { %2792 = vmatprep.subr.bf16.mxu0 %v3143_v1  ;;  %2803 = vmatpush3.bf16.msra.mxu1 %v3296_v29 }
 0xb62   :  { %2804 = vmatprep.subr.bf16.mxu1 %v3143_v1 }
 0xb64   :  { %2794 = vmatpush3.bf16.msra.mxu0 %v3334_v60 }
 0xb65   :  { %2795 = vmatprep.subr.bf16.mxu0 %v3143_v1 }
 0xb68   :  { %2797 = vmatpush3.bf16.msra.mxu0 %v3339_v0 }
 0xb69   :  { %2816 = vmatprep.subr.bf16.mxu0 %v3143_v1 }
 0xc2e   :  { %v1203_v18 = vpop.f32.mrb[8].mxu0 }
 0xc2f   :  { %v1207_v19 = vadd.f32 %v1203_v18, %v3492_v17  ;;  %v1107_v20 = vpop.f32.mrb[8].mxu1  ;;  %v2567_v21 = vpop.f32.mrb[9].mxu0 }
 0xc30   :  { %v1108_v22 = vadd.f32 %v3370_v9, %v1107_v20  ;;  %v2556_v23 = vpop.f32.mrb[9].mxu1 }
 0xc31   :  { %2937 = vtanh.f32 %v1207_v19  ;;  %v2280_v26 = vmul.f32 -1.442695, %v1207_v19 }
 0xc32   :  { %2939 = vtanh.f32 %v1108_v22  ;;  %v2278_v27 = vmul.f32 -1.442695, %v1108_v22 }
 0xc33   :  { %2941 = vpow2.f32 %v2280_v26 }
 0xc34   :  { %2943 = vpow2.f32 %v2278_v27 }
 0xc3b   :  { %v2938_v24 = vpop.eup %2937 }
 0xc3c   :  { %v2940_v25 = vpop.eup %2939  ;;  %1217 = vrot.lane.b32.xlu0 %v2938_v24, %s3147_s25 }
 0xc3d   :  { %1120 = vrot.lane.b32.xlu1 %v2940_v25, %s3147_s25  ;;  %v2942_v28 = vpop.eup %2941 }
 0xc3e   :  { %v2944_v30 = vpop.eup %2943  ;;  %v1211_v31 = vadd.f32 1.0, %v2942_v28 }
 0xc3f   :  { %v1114_v32 = vadd.f32 1.0, %v2944_v30 }
 0xc40   :  { %2945 = vrcp.f32 %v1211_v31 }
 0xc41   :  { %2947 = vrcp.f32 %v1114_v32 }
 0xc4a   :  { %v2946_v33 = vpop.eup %2945 }
 0xc4b   :  { %v2948_v35 = vpop.eup %2947  ;;  %v1215_v41 = vmul.f32 %v2946_v33, %v3460_v63 }
 0xc4c   :  { %v1118_v43 = vmul.f32 %v2948_v35, %v3462_v2 }
 0xcae   :  { %v1218_v34 = vpop.permute.xlu0 %1217 }
 0xcaf   :  { %v1220_v37 = vmul.f32 %v2946_v33, %v1218_v34  ;;  %v1121_v38 = vpop.permute.xlu1 %1120 }
 0xcb0   :  { %v1123_v40 = vmul.f32 %v2948_v35, %v1121_v38 }
 0xcb1   :  { %1222 = vrot.lane.b32.xlu0 %v1220_v37, %s3137_s1 }
 0xcb2   :  { %1125 = vrot.lane.b32.xlu1 %v1123_v40, %s3137_s1 }
 0xd23   :  { %v1223_v42 = vpop.permute.xlu0 %1222 }
 0xd24   :  { %v3502_v44 = vadd.f32 %v1223_v42, %v1215_v41  ;;  %v1126_v45 = vpop.permute.xlu1 %1125 }
 0xd25   :  { %v3504_v46 = vadd.f32 %v1126_v45, %v1118_v43 }
 0xd26   :  { %2949 = vtanh.f32 %v3502_v44 }
 0xd27   :  { %2951 = vtanh.f32 %v3504_v46 }
 0xd30   :  { %v2950_v47 = vpop.eup %2949 }
 0xd31   :  { %v2952_v48 = vpop.eup %2951  ;;  %1228 = vrot.lane.b32.xlu0 %v2950_v47, %s3147_s25 }
 0xd32   :  { %1131 = vrot.lane.b32.xlu1 %v2952_v48, %s3147_s25 }
 0xda3   :  { %v1229_v49 = vpop.permute.xlu0 %1228 }
 0xda4   :  { %v1231_v50 = vmul.f32 %v2946_v33, %v1229_v49  ;;  %v1132_v51 = vpop.permute.xlu1 %1131 }
 0xda5   :  { %v1134_v52 = vmul.f32 %v2948_v35, %v1132_v51 }
 0xda6   :  { %v1239_v53 = vrot.slane %v1231_v50, %v3280_v10 }
 0xda7   :  { %1244 = vrot.lane.b32.xlu1 %v1134_v52, %s3147_s25 }
 0xda8   :  { %1240 = vrot.lane.b32.xlu0 %v1239_v53, %s3137_s1 }
 0xe19   :  { %v1245_v54 = vpop.permute.xlu1 %1244 }
 0xe1a   :  { %v1241_v56 = vpop.permute.xlu0 %1240 }
 0xe1b   :  { %v1247_v58 = vsel %vm296_vm2, %v1241_v56, %v1245_v54  ;;  %2596 = vmatmul.mubr.msk.f32.vlgmr.msra.gmra.mrb[10].mxu1 %vm296_vm2, %v1241_v56 }
 0xe1c   :  { %2585 = vmatmul.mubr.msk.f32.vlgmr.msra.gmra.mrb[10].mxu0 %vm407_vm3, %v1247_v58  ;;  %2806 = vmatpush3.bf16.msra.mxu1 %v3327_v55 }
 0xe1d   :  { %2807 = vmatprep.subr.bf16.mxu1 %v3143_v1  ;;  %2818 = vmatpush3.bf16.msra.mxu0 %v3282_v11 }
 0xe1e   :  { %2819 = vmatprep.subr.bf16.mxu0 %v3143_v1  ;;  %2625 = vmatprep.mubr.msk.f32.mxu0 %vm3145_vm0, %v3146_v4 }
 0xe1f   :  { %2614 = vmatprep.mubr.msk.f32.mxu1 %vm3145_vm0, %v3146_v4 }
 0xe20   :  { %2809 = vmatpush3.bf16.msra.mxu1 %v3330_v57 }
 0xe21   :  { %2810 = vmatprep.subr.bf16.mxu1 %v3143_v1  ;;  %2821 = vmatpush3.bf16.msra.mxu0 %v3296_v29 }
 0xe22   :  { %2822 = vmatprep.subr.bf16.mxu0 %v3143_v1 }
 0xe24   :  { %2812 = vmatpush3.bf16.msra.mxu1 %v3334_v60 }
 0xe25   :  { %2813 = vmatprep.subr.bf16.mxu1 %v3143_v1 }
 0xe28   :  { %2815 = vmatpush3.bf16.msra.mxu1 %v3339_v0 }
 0xe29   :  { %2834 = vmatprep.subr.bf16.mxu1 %v3143_v1 }
 0xeee   :  { %v1413_v61 = vpop.f32.mrb[10].mxu1 }
 0xeef   :  { %v1417_v62 = vadd.f32 %v1413_v61, %v267_v59  ;;  %v1317_v63 = vpop.f32.mrb[10].mxu0  ;;  %v2597_v39 = vpop.f32.mrb[11].mxu1 }
 0xef0   :  { %v1318_v2 = vadd.f32 %v3370_v9, %v1317_v63  ;;  %v2586_v3 = vpop.f32.mrb[11].mxu0 }
 0xef1   :  { %2953 = vtanh.f32 %v1417_v62  ;;  %v2284_v7 = vmul.f32 -1.442695, %v1417_v62 }
 0xef2   :  { %2955 = vtanh.f32 %v1318_v2  ;;  %v2282_v8 = vmul.f32 -1.442695, %v1318_v2 }
 0xef3   :  { %2957 = vpow2.f32 %v2284_v7 }
 0xef4   :  { %2959 = vpow2.f32 %v2282_v8 }
 0xefb   :  { %v2954_v5 = vpop.eup %2953 }
 0xefc   :  { %v2956_v6 = vpop.eup %2955  ;;  %1427 = vrot.lane.b32.xlu0 %v2954_v5, %s3147_s25 }
 0xefd   :  { %1330 = vrot.lane.b32.xlu1 %v2956_v6, %s3147_s25  ;;  %v2958_v12 = vpop.eup %2957 }
 0xefe   :  { %v2960_v13 = vpop.eup %2959  ;;  %v1421_v14 = vadd.f32 1.0, %v2958_v12 }
 0xeff   :  { %v1324_v15 = vadd.f32 1.0, %v2960_v13 }
 0xf00   :  { %2961 = vrcp.f32 %v1421_v14 }
 0xf01   :  { %2963 = vrcp.f32 %v1324_v15 }
 0xf0a   :  { %v2962_v16 = vpop.eup %2961 }
 0xf0b   :  { %v2964_v18 = vpop.eup %2963  ;;  %v1425_v22 = vmul.f32 %v2962_v16, %v3502_v44 }
 0xf0c   :  { %v1328_v24 = vmul.f32 %v2964_v18, %v3504_v46 }
 0xf6e   :  { %v1428_v17 = vpop.permute.xlu0 %1427 }
 0xf6f   :  { %v1430_v19 = vmul.f32 %v2962_v16, %v1428_v17  ;;  %v1331_v20 = vpop.permute.xlu1 %1330 }
 0xf70   :  { %v1333_v21 = vmul.f32 %v2964_v18, %v1331_v20 }
 0xf71   :  { %1432 = vrot.lane.b32.xlu0 %v1430_v19, %s3137_s1 }
 0xf72   :  { %1335 = vrot.lane.b32.xlu1 %v1333_v21, %s3137_s1 }
 0xfe3   :  { %v1433_v23 = vpop.permute.xlu0 %1432 }
 0xfe4   :  { %v3541_v25 = vadd.f32 %v1433_v23, %v1425_v22  ;;  %v1336_v26 = vpop.permute.xlu1 %1335 }
 0xfe5   :  { %v3543_v27 = vadd.f32 %v1336_v26, %v1328_v24 }
 0xfe6   :  { %2965 = vtanh.f32 %v3541_v25 }
 0xfe7   :  { %2967 = vtanh.f32 %v3543_v27 }
 0xff0   :  { %v2966_v28 = vpop.eup %2965 }
 0xff1   :  { %v2968_v30 = vpop.eup %2967  ;;  %1438 = vrot.lane.b32.xlu0 %v2966_v28, %s3147_s25 }
 0xff2   :  { %1341 = vrot.lane.b32.xlu1 %v2968_v30, %s3147_s25 }
0x1063   :  { %v1439_v31 = vpop.permute.xlu0 %1438 }
0x1064   :  { %v1441_v32 = vmul.f32 %v2962_v16, %v1439_v31  ;;  %v1342_v33 = vpop.permute.xlu1 %1341 }
0x1065   :  { %v1344_v34 = vmul.f32 %v2964_v18, %v1342_v33 }
0x1066   :  { %v1449_v35 = vrot.slane %v1441_v32, %v3280_v10 }
0x1067   :  { %1454 = vrot.lane.b32.xlu1 %v1344_v34, %s3147_s25 }
0x1068   :  { %1450 = vrot.lane.b32.xlu0 %v1449_v35, %s3137_s1 }
0x10d9   :  { %v1455_v37 = vpop.permute.xlu1 %1454 }
0x10da   :  { %v1451_v38 = vpop.permute.xlu0 %1450 }
0x10db   :  { %v1457_v40 = vsel %vm296_vm2, %v1451_v38, %v1455_v37  ;;  %2626 = vmatmul.mubr.msk.f32.vlgmr.msra.gmra.mrb[12].mxu0 %vm296_vm2, %v1451_v38 }
0x10dc   :  { %2615 = vmatmul.mubr.msk.f32.vlgmr.msra.gmra.mrb[12].mxu1 %vm407_vm3, %v1457_v40  ;;  %2824 = vmatpush3.bf16.msra.mxu0 %v3327_v55 }
0x10dd   :  { %2825 = vmatprep.subr.bf16.mxu0 %v3143_v1  ;;  %2836 = vmatpush3.bf16.msra.mxu1 %v3282_v11  ;;  %v252_v11 = vcombine.high %v3313_v36, %v3313_v36 }
0x10de   :  { %2837 = vmatprep.subr.bf16.mxu1 %v3143_v1  ;;  %2655 = vmatprep.mubr.msk.f32.mxu1 %vm3145_vm0, %v3146_v4 }
0x10df   :  { %2644 = vmatprep.mubr.msk.f32.mxu0 %vm3145_vm0, %v3146_v4  ;;  %v3574_v41 = vrot.slane %v252_v11, %v3280_v10 }
0x10e0   :  { %2827 = vmatpush3.bf16.msra.mxu0 %v3330_v57 }
0x10e1   :  { %2828 = vmatprep.subr.bf16.mxu0 %v3143_v1  ;;  %2839 = vmatpush3.bf16.msra.mxu1 %v3296_v29 }
0x10e2   :  { %2840 = vmatprep.subr.bf16.mxu1 %v3143_v1 }
0x10e4   :  { %2830 = vmatpush3.bf16.msra.mxu0 %v3334_v60 }
0x10e5   :  { %2831 = vmatprep.subr.bf16.mxu0 %v3143_v1 }
0x10e8   :  { %2833 = vmatpush3.bf16.msra.mxu0 %v3339_v0 }
0x10e9   :  { %2852 = vmatprep.subr.bf16.mxu0 %v3143_v1 }
0x11ae   :  { %v1623_v42 = vpop.f32.mrb[12].mxu0 }
0x11af   :  { %v1627_v43 = vadd.f32 %v1623_v42, %v3574_v41  ;;  %v1527_v29 = vpop.f32.mrb[12].mxu1  ;;  %v2627_v44 = vpop.f32.mrb[13].mxu0 }
0x11b0   :  { %v1528_v45 = vadd.f32 %v3370_v9, %v1527_v29  ;;  %v2616_v46 = vpop.f32.mrb[13].mxu1 }
0x11b1   :  { %2969 = vtanh.f32 %v1627_v43  ;;  %v2288_v36 = vmul.f32 -1.442695, %v1627_v43 }
0x11b2   :  { %2971 = vtanh.f32 %v1528_v45  ;;  %v2286_v49 = vmul.f32 -1.442695, %v1528_v45 }
0x11b3   :  { %2973 = vpow2.f32 %v2288_v36 }
0x11b4   :  { %2975 = vpow2.f32 %v2286_v49 }
0x11bb   :  { %v2970_v47 = vpop.eup %2969 }
0x11bc   :  { %v2972_v48 = vpop.eup %2971  ;;  %1637 = vrot.lane.b32.xlu0 %v2970_v47, %s3147_s25 }
0x11bd   :  { %1540 = vrot.lane.b32.xlu1 %v2972_v48, %s3147_s25  ;;  %v2974_v50 = vpop.eup %2973 }
0x11be   :  { %v2976_v51 = vpop.eup %2975  ;;  %v1631_v52 = vadd.f32 1.0, %v2974_v50 }
0x11bf   :  { %v1534_v53 = vadd.f32 1.0, %v2976_v51 }
0x11c0   :  { %2977 = vrcp.f32 %v1631_v52 }
0x11c1   :  { %2979 = vrcp.f32 %v1534_v53 }
0x11ca   :  { %v2978_v54 = vpop.eup %2977 }
0x11cb   :  { %v2980_v58 = vpop.eup %2979  ;;  %v1635_v63 = vmul.f32 %v2978_v54, %v3541_v25 }
0x11cc   :  { %v1538_v2 = vmul.f32 %v2980_v58, %v3543_v27 }
0x122e   :  { %v1638_v56 = vpop.permute.xlu0 %1637 }
0x122f   :  { %v1640_v59 = vmul.f32 %v2978_v54, %v1638_v56  ;;  %v1541_v61 = vpop.permute.xlu1 %1540 }
0x1230   :  { %v1543_v62 = vmul.f32 %v2980_v58, %v1541_v61 }
0x1231   :  { %1642 = vrot.lane.b32.xlu0 %v1640_v59, %s3137_s1 }
0x1232   :  { %1545 = vrot.lane.b32.xlu1 %v1543_v62, %s3137_s1 }
0x12a3   :  { %v1643_v39 = vpop.permute.xlu0 %1642 }
0x12a4   :  { %v1645_v3 = vadd.f32 %v1643_v39, %v1635_v63  ;;  %v1546_v5 = vpop.permute.xlu1 %1545 }
0x12a5   :  { %v1548_v6 = vadd.f32 %v1546_v5, %v1538_v2 }
0x12a6   :  { %2981 = vtanh.f32 %v1645_v3 }
0x12a7   :  { %2983 = vtanh.f32 %v1548_v6 }
0x12b0   :  { %v2982_v7 = vpop.eup %2981 }
0x12b1   :  { %v2984_v8 = vpop.eup %2983  ;;  %1648 = vrot.lane.b32.xlu0 %v2982_v7, %s3147_s25  ;;  %v1977_v7 = vld [vmem:[%s3686_s6 + $0x10] sm:$0xff] }
0x12b2   :  { %1551 = vrot.lane.b32.xlu1 %v2984_v8, %s3147_s25 }
0x1323   :  { %v1649_v12 = vpop.permute.xlu0 %1648 }
0x1324   :  { %v1651_v13 = vmul.f32 %v2978_v54, %v1649_v12  ;;  %v1552_v14 = vpop.permute.xlu1 %1551  ;;  %v1978_v12 = vld [vmem:[%s3686_s6 + $0x18] sm:$0xff] }
0x1325   :  { %v1554_v15 = vmul.f32 %v2980_v58, %v1552_v14 }
0x1326   :  { %v1659_v16 = vrot.slane %v1651_v13, %v3280_v10  ;;  %v2856_v13 = vpack.c.bf16 %v1978_v12, %v1977_v7 }
0x1327   :  { %1664 = vrot.lane.b32.xlu1 %v1554_v15, %s3147_s25 }
0x1328   :  { %1660 = vrot.lane.b32.xlu0 %v1659_v16, %s3137_s1 }
0x1399   :  { %v1665_v17 = vpop.permute.xlu1 %1664 }
0x139a   :  { %v1661_v18 = vpop.permute.xlu0 %1660 }
0x139b   :  { %v1667_v19 = vsel %vm296_vm2, %v1661_v18, %v1665_v17  ;;  %2656 = vmatmul.mubr.msk.f32.vlgmr.msra.gmra.mrb[14].mxu1 %vm296_vm2, %v1661_v18  ;;  %v2067_v18 = vld [vmem:[#allocation8] sm:$0xff] }
0x139c   :  { %2645 = vmatmul.mubr.msk.f32.vlgmr.msra.gmra.mrb[14].mxu0 %vm407_vm3, %v1667_v19  ;;  %2842 = vmatpush3.bf16.msra.mxu1 %v3327_v55  ;;  %v268_v55 = vcombine.high %v3574_v41, %v3574_v41  ;;  %v2068_v19 = vld [vmem:[#allocation8 + $0x8] sm:$0xff] }
0x139d   :  { %2843 = vmatprep.subr.bf16.mxu1 %v3143_v1  ;;  %2674 = vmatprep.mubr.msk.f32.mxu1 %vm3145_vm0, %v3146_v4 }
0x139e   :  { %2685 = vmatprep.mubr.msk.f32.mxu0 %vm3145_vm0, %v3146_v4 }
0x13a0   :  { %2845 = vmatpush3.bf16.msra.mxu1 %v3330_v57 }
0x13a1   :  { %2846 = vmatprep.subr.bf16.mxu1 %v3143_v1 }
0x13a4   :  { %2848 = vmatpush3.bf16.msra.mxu1 %v3334_v60 }
0x13a5   :  { %2849 = vmatprep.subr.bf16.mxu1 %v3143_v1 }
0x13a8   :  { %2851 = vmatpush3.bf16.msra.mxu1 %v3339_v0 }
0x13a9   :  { %2858 = vmatprep.subr.bf16.mxu1 %v3143_v1 }
0x146e   :  { %v1833_v20 = vpop.f32.mrb[14].mxu1 }
0x146f   :  { %v1837_v21 = vadd.f32 %v1833_v20, %v268_v55  ;;  %v1737_v22 = vpop.f32.mrb[14].mxu0  ;;  %v2657_v23 = vpop.f32.mrb[15].mxu1  ;;  %v2859_v55 = vpack.c.bf16 %v2068_v19, %v2067_v18  ;;  %v2295_v20 = vld [vmem:[%s3687_s7] ss:$0 sm:$0xff] }
0x1470   :  { %v1738_v24 = vadd.f32 %v3370_v9, %v1737_v22  ;;  %v2646_v57 = vpop.f32.mrb[15].mxu0 }
0x1471   :  { %2985 = vtanh.f32 %v1837_v21  ;;  %v2292_v0 = vmul.f32 -1.442695, %v1837_v21 }
0x1472   :  { %2987 = vtanh.f32 %v1738_v24  ;;  %v2290_v26 = vmul.f32 -1.442695, %v1738_v24 }
0x1473   :  { %2989 = vpow2.f32 %v2292_v0  ;;  %v2156_v0 = vld [vmem:[%s3690_s10] sm:$0xff] }
0x1474   :  { %2991 = vpow2.f32 %v2290_v26  ;;  %v2157_v26 = vld [vmem:[%s3690_s10 + $0x8] sm:$0xff] }
0x147b   :  { %v2986_v25 = vpop.eup %2985 }
0x147c   :  { %v2988_v60 = vpop.eup %2987  ;;  %1847 = vrot.lane.b32.xlu0 %v2986_v25, %s3147_s25 }
0x147d   :  { %1750 = vrot.lane.b32.xlu1 %v2988_v60, %s3147_s25  ;;  %v2990_v27 = vpop.eup %2989 }
0x147e   :  { %v2992_v28 = vpop.eup %2991  ;;  %v1841_v30 = vadd.f32 1.0, %v2990_v27  ;;  %v2862_v27 = vpack.c.bf16 %v2157_v26, %v2156_v0 }
0x147f   :  { %v1744_v31 = vadd.f32 1.0, %v2992_v28  ;;  %v2158_v28 = vld [vmem:[%s3690_s10 + $0x10] sm:$0xff] }
0x1480   :  { %2993 = vrcp.f32 %v1841_v30  ;;  %v2159_v30 = vld [vmem:[%s3690_s10 + $0x18] sm:$0xff] }
0x1481   :  { %2995 = vrcp.f32 %v1744_v31  ;;  %v2865_v31 = vpack.c.bf16 %v2159_v30, %v2158_v28 }
0x148a   :  { %v2994_v32 = vpop.eup %2993 }
0x148b   :  { %v2996_v34 = vpop.eup %2995  ;;  %v1845_v40 = vmul.f32 %v2994_v32, %v1645_v3 }
0x148c   :  { %v1748_v41 = vmul.f32 %v2996_v34, %v1548_v6  ;;  %v1976_v6 = vld [vmem:[%s3686_s6 + $0x8] sm:$0xff] }
0x14ee   :  { %v1848_v33 = vpop.permute.xlu0 %1847 }
0x14ef   :  { %v1850_v35 = vmul.f32 %v2994_v32, %v1848_v33  ;;  %v1751_v37 = vpop.permute.xlu1 %1750  ;;  %v2298_v33 = vld [vmem:[%s3689_s9] ss:$0 sm:$0xff] }
0x14f0   :  { %v1753_v38 = vmul.f32 %v2996_v34, %v1751_v37 }
0x14f1   :  { %1852 = vrot.lane.b32.xlu0 %v1850_v35, %s3137_s1 }
0x14f2   :  { %1755 = vrot.lane.b32.xlu1 %v1753_v38, %s3137_s1 }
0x1563   :  { %v1853_v11 = vpop.permute.xlu0 %1852 }
0x1564   :  { %v1855_v42 = vadd.f32 %v1853_v11, %v1845_v40  ;;  %v1756_v43 = vpop.permute.xlu1 %1755 }
0x1565   :  { %v1758_v29 = vadd.f32 %v1756_v43, %v1748_v41 }
0x1566   :  { %2997 = vtanh.f32 %v1855_v42 }
0x1567   :  { %2999 = vtanh.f32 %v1758_v29 }
0x1570   :  { %v2998_v44 = vpop.eup %2997 }
0x1571   :  { %v3000_v45 = vpop.eup %2999  ;;  %1858 = vrot.lane.b32.xlu0 %v2998_v44, %s3147_s25 }
0x1572   :  { %1761 = vrot.lane.b32.xlu1 %v3000_v45, %s3147_s25 }
0x15e3   :  { %v1859_v46 = vpop.permute.xlu0 %1858 }
0x15e4   :  { %v1861_v47 = vmul.f32 %v2994_v32, %v1859_v46  ;;  %v1762_v48 = vpop.permute.xlu1 %1761  ;;  %v2160_v32 = vld [vmem:[%s3690_s10 + $0x20] sm:$0xff]  ;;  %s3148_s10 = smov [#allocation10]  }
0x15e5   :  { %v1764_v36 = vmul.f32 %v2996_v34, %v1762_v48 }
0x15e6   :  { %v1869_v49 = vrot.slane %v1861_v47, %v3280_v10 }
0x15e7   :  { %1874 = vrot.lane.b32.xlu1 %v1764_v36, %s3147_s25 }
0x15e8   :  { %1870 = vrot.lane.b32.xlu0 %v1869_v49, %s3137_s1 }
0x1659   :  { %v1875_v50 = vpop.permute.xlu1 %1874 }
0x165a   :  { %v1871_v51 = vpop.permute.xlu0 %1870 }
0x165b   :  { %v1877_v52 = vsel %vm296_vm2, %v1871_v51, %v1875_v50 }
0x165c   :  { %2675 = vmatmul.mubr.msk.f32.vlgmr.msra.gmra.mrb[16].mxu1 %vm407_vm3, %v1877_v52 }
0x165d   :  { %2692 = vmatprep.mubr.msk.f32.mxu1 %vm3145_vm0, %v3146_v4  ;;  %2860 = vmatpush3.bf16.msra.mxu1 %v2859_v55 }
0x172f   :  { %v1947_v53 = vpop.f32.mrb[16].mxu1 }
0x1730   :  { %v1948_v54 = vadd.f32 %v3370_v9, %v1947_v53  ;;  %v2676_v56 = vpop.f32.mrb[17].mxu1  ;;  %v1975_v9 = vld [vmem:[%s3686_s6] sm:$0xff] }
0x1731   :  { %v2853_v8 = vpack.c.bf16 %v1976_v6, %v1975_v9 }
0x1732   :  { %3001 = vtanh.f32 %v1948_v54  ;;  %v2294_v10 = vmul.f32 -1.442695, %v1948_v54 }
0x1733   :  { %2854 = vmatpush3.bf16.msra.mxu0 %v2853_v8 }
0x1734   :  { %3003 = vpow2.f32 %v2294_v10  ;;  %2855 = vmatprep.subr.bf16.mxu0 %v3143_v1 }
0x1737   :  { %2857 = vmatpush3.bf16.msra.mxu0 %v2856_v13 }
0x1738   :  { %2861 = vmatprep.subr.bf16.mxu0 %v3143_v1 }
0x173c   :  { %v3002_v58 = vpop.eup %3001 }
0x173d   :  { %1960 = vrot.lane.b32.xlu0 %v3002_v58, %s3147_s25 }
0x173e   :  { %v3004_v59 = vpop.eup %3003 }
0x173f   :  { %v1954_v61 = vadd.f32 1.0, %v3004_v59 }
0x1741   :  { %3005 = vrcp.f32 %v1954_v61 }
0x174b   :  { %v3006_v62 = vpop.eup %3005 }
0x174c   :  { %v1958_v2 = vmul.f32 %v3006_v62, %v1758_v29 }
0x17af   :  { %v1961_v63 = vpop.permute.xlu0 %1960 }
0x17b0   :  { %v1963_v39 = vmul.f32 %v3006_v62, %v1961_v63 }
0x17b2   :  { %1965 = vrot.lane.b32.xlu1 %v1963_v39, %s3137_s1 }
0x1824   :  { %v1966_v3 = vpop.permute.xlu1 %1965 }
0x1825   :  { %v1968_v5 = vadd.f32 %v1966_v3, %v1958_v2 }
0x1827   :  { %3007 = vtanh.f32 %v1968_v5 }
0x1831   :  { %v3008_v14 = vpop.eup %3007 }
0x1832   :  { %1971 = vrot.lane.b32.xlu0 %v3008_v14, %s3147_s25  ;;  %s2249_s25 = sshll.u32 %s3148_s10, 4  ;;  %s2250_s25 = int_to_ptr.vmem [resolvable:$true] %s2249_s25 }
0x1833   :  { %s3105_s9 = scalar_lea.vmem %s2250_s25, 32  ;;  %p3110_p5 = scmp.lt.s32.totalorder %s2250_s25, %s2250_s25 }
0x1834   :  { %p3106_p4 = scmp.ne.s32.totalorder %s2250_s25, %s3105_s9  ;;  %p3111_p6 = scmp.lt.s32.totalorder %s3105_s9, %s3105_s9 }
0x1836   :  { %p3112_p7 = por %p3111_p6, %p3110_p5 }
0x1838   :  { %p3113_p8 = pnand %p3112_p7, %p3106_p4 }
0x18a4   :  { %v1972_v15 = vpop.permute.xlu0 %1971 }
0x18a5   :  { %v1974_v16 = vmul.f32 %v3006_v62, %v1972_v15 }
0x18a7   :  { %1987 = vrot.lane.b32.xlu1 %v1974_v16, %s3137_s1 }
0x1919   :  { %v1988_v17 = vpop.permute.xlu1 %1987 }
0x191a   :  { %2686 = vmatmul.mubr.msk.f32.vlgmr.msra.gmra.mrb[16].mxu0 %vm296_vm2, %v1988_v17 }
0x191b   :  { %2705 = vmatprep.mubr.msk.f32.mxu0 %vm3145_vm0, %v3146_v4  ;;  %2863 = vmatpush3.bf16.msra.mxu0 %v2862_v27 }
0x191c   :  { %2864 = vmatprep.subr.bf16.mxu0 %v3143_v1 }
0x191f   :  { %2866 = vmatpush3.bf16.msra.mxu0 %v2865_v31 }
0x1920   :  { %2703 = vmatprep.subr.mxu0 %v3146_v4  ;;  %v2301_v4 = vld [vmem:[%s3691_s11] ss:$0 sm:$0xff] }
0x1923   :  { %2704 = vmatpush3.msra.mxu0 %v2160_v32 }
0x19ed   :  { %v2057_v21 = vpop.f32.mrb[16].mxu0 }
0x19ee   :  { %v2058_v22 = vadd.f32 %v2295_v20, %v2057_v21  ;;  %v2687_v23 = vpop.f32.mrb[17].mxu0 }
0x19f0   :  { %v2297_v24 = vmul.f32 -1.442695, %v2058_v22 }
0x19f2   :  { %3009 = vpow2.f32 %v2297_v24 }
0x19fc   :  { %v3010_v57 = vpop.eup %3009 }
0x19fd   :  { %v2064_v25 = vadd.f32 1.0, %v3010_v57 }
0x19ff   :  { %3011 = vrcp.f32 %v2064_v25 }
0x1a09   :  { %v3012_v60 = vpop.eup %3011 }
0x1a0a   :  { %2693 = vmatmul.mubr.msk.f32.vlgmr.msra.gmra.mrb[18].mxu1 %vm2076_vm4, %v3012_v60 }
0x1add   :  { %v2146_v34 = vpop.f32.mrb[18].mxu1 }
0x1ade   :  { %v2147_v35 = vadd.f32 %v2298_v33, %v2146_v34  ;;  %v2694_v37 = vpop.f32.mrb[19].mxu1 }
0x1ae0   :  { %v2300_v38 = vmul.f32 -1.442695, %v2147_v35 }
0x1ae2   :  { %3013 = vpow2.f32 %v2300_v38 }
0x1aec   :  { %v3014_v40 = vpop.eup %3013 }
0x1aed   :  { %v2153_v11 = vadd.f32 1.0, %v3014_v40 }
0x1aef   :  { %3015 = vrcp.f32 %v2153_v11 }
0x1af9   :  { %v3016_v1 = vpop.eup %3015 }
0x1afa   :  { %2706 = vmatmul.mubr.msk.f32.vlgmr.msra.gmra.mrb[18].mxu0 %vm2168_vm5, %v3016_v1 }
0x1bcd   :  { %v2238_v41 = vpop.f32.mrb[18].mxu0 }
0x1bce   :  { %v2239_v42 = vadd.f32 %v2301_v4, %v2238_v41  ;;  %v2707_v43 = vpop.f32.mrb[19].mxu0 }
0x1bd0   :  { %2242 = vst [vmem:[#allocation10] sm:$0x3] %v2239_v42 }
0x1bd1   :  { %3116 = shalt.err (!%p3113_p8)
}
0x1bd2   :  { %s3117_s5 = scalar_lea.hbm %s3692_s12, 32 }
0x1bd3   :  { %p3118_p9 = scmp.ne.s32.totalorder %s3692_s12, %s3117_s5  ;;  %p3121_p10 = scmp.lt.u32.totalorder %s3117_s5, %s3692_s12 }
0x1bd5   :  { %p3123_p11 = pnand %p3121_p10, %p3118_p9 }
0x1bd7   :  { %3126 = shalt.err (!%p3123_p11)
}
0x1bd8   :  { %2252 = dma.vmem_to_hbm [thread:$0]  %s2250_s25, 32, %s3692_s12, [#allocation4]  }
0x1bd9   :  { %3133 = dma.done.wait [#allocation4], 32  }
0x1bda   :  { %3134 = vsyncadd [#allocation4], 4294967264 }
0x1bdb   :  { %2256 = vsyncpa [#allocation3], 1 }
0x1bdc   :  { %2257 = vsyncpa [#allocation6], 1 }
0x1bdd   :  { %2258 = vsyncpa [#allocation9], 1 }
0x1bde   :  { %2259 = vsyncpa [#allocation4], 1 }

</bundles_post_ra>
